<compile_context>
chip_gen: v5e
topology: v5e:2x2
jax: 0.10.0
libtpu: 0.0.40
codegen_flags: <defaults>
</compile_context>

<pallas_src>
import numpy as np
import jax
import jax.numpy as jnp
from jax.experimental import pallas as pl
from jax.experimental.pallas import tpu as pltpu


# --------------------------- bilinear weights (host) ------------------------

def _resize_matrix(out_size, in_size):
    """PyTorch bilinear interpolation weights (align_corners=False) as a dense matrix."""
    scale = in_size / out_size
    o = np.arange(out_size, dtype=np.float64)
    src = np.maximum((o + 0.5) * scale - 0.5, 0.0)
    i0 = np.minimum(np.floor(src).astype(np.int64), in_size - 1)
    i1 = np.minimum(i0 + 1, in_size - 1)
    w1 = src - i0
    w0 = 1.0 - w1
    R = np.zeros((out_size, in_size), dtype=np.float32)
    R[np.arange(out_size), i0] += w0.astype(np.float32)
    R[np.arange(out_size), i1] += w1.astype(np.float32)
    return R


# ------------------------------- fused kernel -------------------------------

def _make_depth_head_kernel(nf, cin, cpl, out_ch, level_hw, h4, w4, mh, mw):
    """Build the fused DepthHead kernel (all static shapes closed over)."""
    bf16 = jnp.bfloat16
    f32 = jnp.float32
    cc = nf * cpl            # conv3x3 input channels (folded concat)
    K = 9 * cc               # conv3x3 contraction length (taps x channels)

    def kernel(*refs):
        x_refs = refs[0:nf]
        w1_ref = refs[nf]
        rh_refs = refs[nf + 1:2 * nf + 1]
        rwt_refs = refs[2 * nf + 1:3 * nf + 1]
        w9_ref, b_ref, rhf_ref, rwft_ref, o_ref, pad_ref, col_ref = refs[3 * nf + 1:]

        # Zero only the 1-pixel border of the conv3x3 pad scratch (the interior is fully
        # overwritten below; per-step zeroing keeps this megacore-safe).
        zrow = jnp.zeros((1, cc, w4 + 2), bf16)
        pad_ref[0:1, :, :] = zrow
        pad_ref[h4 + 1:h4 + 2, :, :] = zrow
        zcol = jnp.zeros((h4 + 2, cc, 1), bf16)
        pad_ref[:, :, 0:1] = zcol
        pad_ref[:, :, w4 + 1:w4 + 2] = zcol

        # ---- per level: separable bilinear downsample + 1x1 conv (channels-first) ----
        for i in range(nf):
            H, W = level_hw[i]
            x = x_refs[i][0]                                        # (cin, H, W) bf16
            # W-resize: one dense 2D matmul, spatial rows stacked on the M axis.
            t = jnp.dot(x.reshape(cin * H, W), rwt_refs[i][...],
                        preferred_element_type=f32)                 # (cin*H, w4)
            t = t.reshape(cin, H, w4).astype(bf16)
            # H-resize: batched matmul over cin: (h4, H) @ (H, w4).
            rhb = jnp.broadcast_to(rh_refs[i][...][None], (cin, h4, H))
            z = jnp.einsum('bij,bjk->bik', rhb, t,
                           preferred_element_type=f32)              # (cin, h4, w4)
            # 1x1 conv (bias=False) at low resolution, batched over h4 (commutes with resize).
            zt = jnp.transpose(z, (1, 0, 2)).astype(bf16)           # (h4, cin, w4)
            w1b = jnp.broadcast_to(w1_ref[i][None], (h4, cpl, cin))
            u = jnp.einsum('bij,bjk->bik', w1b, zt,
                           preferred_element_type=f32)              # (h4, cpl, w4)
            # channel concat == writing into this level's sublane slot of the pad scratch
            pad_ref[1:h4 + 1, i * cpl:(i + 1) * cpl, 1:w4 + 1] = u.astype(bf16)

        # ---- 3x3 conv (pad=1) + bias + ReLU: im2col in VMEM + ONE batched matmul ----
        for ky in range(3):
            for kx in range(3):
                tap = ky * 3 + kx
                col_ref[:, tap * cc:(tap + 1) * cc, :] = pad_ref[ky:ky + h4, :, kx:kx + w4]
        w9b = jnp.broadcast_to(w9_ref[...][None], (h4, out_ch, K))
        acc = jnp.einsum('bij,bjk->bik', w9b, col_ref[...],
                         preferred_element_type=f32)                # (h4, out_ch, w4)
        act = jnp.maximum(acc + b_ref[...][None, :, :], 0.0)        # f32

        # ---- final bilinear upsample (separable: Rh then Rw), lane-dense output ----
        a = jnp.transpose(act, (1, 0, 2)).astype(bf16)              # (out_ch, h4, w4)
        rhfb = jnp.broadcast_to(rhf_ref[...][None], (out_ch, mh, h4))
        t = jnp.einsum('bij,bjk->bik', rhfb, a,
                       preferred_element_type=f32)                  # (out_ch, mh, w4)
        t = t.reshape(out_ch * mh, w4).astype(bf16)
        res = jnp.dot(t, rwft_ref[...], preferred_element_type=f32)  # (out_ch*mh, mw)
        o_ref[0] = res.reshape(out_ch, mh, mw)

    return kernel


# ------------------------------- DepthHead ----------------------------------

class DepthHeadPallas:
    """Pallas TPU implementation of DepthHead.forward:
    per-level conv1x1 -> bilinear downsample -> concat -> conv3x3+bias -> ReLU -> bilinear upsample."""

    def __init__(self, in_planes, out_planes, num_features, out_ch, key):
        self.nf = num_features
        self.cin = in_planes * 4
        self.cpl = out_planes               # channels per level after conv1x1
        self.out_ch = out_ch
        cc = in_planes * num_features       # conv3x3 input channels (original module)
        assert cc == out_planes * num_features, \
            "DepthHead requires in_planes == out_planes for the concat/conv3x3 channels to match"

        k1, k2, k3 = jax.random.split(key, 3)
        # 1x1 conv weights: PyTorch layout (Cout, Cin) per level, stacked (nf, cpl, cin), bias=False.
        self.w1_f32 = 0.1 * jax.random.normal(k1, (num_features, self.cpl, self.cin), jnp.float32)
        self.w1_bf16 = self.w1_f32.astype(jnp.bfloat16)
        # 3x3 conv: PyTorch layout (out_ch, Cc, 3, 3) + bias.
        self.depth_w_f32 = 0.1 * jax.random.normal(k2, (out_ch, cc, 3, 3), jnp.float32)
        self.depth_b_f32 = 0.1 * jax.random.normal(k3, (out_ch,), jnp.float32)
        # Fold the channel concat + taps into a flat (out_ch, 9*cc) matrix whose column order
        # (tap-major, then level-major channel) matches the in-kernel im2col layout.
        w9 = jnp.transpose(self.depth_w_f32, (0, 2, 3, 1))          # (out_ch, 3, 3, cc)
        self.w9_bf16 = w9.reshape(out_ch, 9 * cc).astype(jnp.bfloat16)
        self.bias_col = self.depth_b_f32.reshape(out_ch, 1).astype(jnp.float32)

    def __call__(self, inputs, mask_size):
        mh, mw = int(mask_size[0]), int(mask_size[1])
        assert mh % 4 == 0 and mw % 4 == 0, "mask_size must be divisible by 4"
        h4, w4 = mh // 4, mw // 4
        nf, cin, cpl, out_ch = self.nf, self.cin, self.cpl, self.out_ch
        assert len(inputs) == nf
        N = inputs[0].shape[0]
        for x in inputs:
            assert x.shape[0] == N and x.shape[1] == cin

        level_hw = [(int(x.shape[2]), int(x.shape[3])) for x in inputs]
        # bf16 inputs: halves HBM->VMEM DMA; the kernel computes in bf16 / f32-accumulate anyway.
        x_bf16 = [x.astype(jnp.bfloat16) for x in inputs]

        # Separable bilinear operators (tiny, fetched once via constant index_maps).
        rh = [jnp.asarray(_resize_matrix(h4, h), jnp.bfloat16) for (h, _) in level_hw]
        rw_t = [jnp.asarray(_resize_matrix(w4, w).T, jnp.bfloat16) for (_, w) in level_hw]
        rhf = jnp.asarray(_resize_matrix(mh, h4), jnp.bfloat16)
        rwf_t = jnp.asarray(_resize_matrix(mw, w4).T, jnp.bfloat16)

        K = 9 * nf * cpl
        kernel = _make_depth_head_kernel(nf, cin, cpl, out_ch, level_hw, h4, w4, mh, mw)

        in_specs = (
            [pl.BlockSpec((1, cin, h, w), lambda n: (n, 0, 0, 0)) for (h, w) in level_hw]
            + [pl.BlockSpec((nf, cpl, cin), lambda n: (0, 0, 0))]
            + [pl.BlockSpec((h4, h), lambda n: (0, 0)) for (h, _) in level_hw]
            + [pl.BlockSpec((w, w4), lambda n: (0, 0)) for (_, w) in level_hw]
            + [pl.BlockSpec((out_ch, K), lambda n: (0, 0)),
               pl.BlockSpec((out_ch, 1), lambda n: (0, 0)),
               pl.BlockSpec((mh, h4), lambda n: (0, 0)),
               pl.BlockSpec((w4, mw), lambda n: (0, 0))])
        out_spec = pl.BlockSpec((1, out_ch, mh, mw), lambda n: (n, 0, 0, 0))

        # VMEM budget derived from the actual shapes (clamped to v7x's 64 MiB/TC).
        in_block = sum(cin * h * w * 2 for (h, w) in level_hw)
        out_block = out_ch * mh * mw * 4
        const_b = (nf * cpl * cin + out_ch * K + mh * h4 + w4 * mw
                   + sum(h4 * h + w * w4 for (h, w) in level_hw)) * 2 + out_ch * 4
        scratch_b = ((h4 + 2) * nf * cpl * (w4 + 2) + h4 * K * w4) * 2
        tmp_b = 6 * max(cin * h * w for (h, w) in level_hw) * 4 + 8 * out_ch * mh * mw * 4
        est = 2 * (in_block + out_block + const_b) + scratch_b + tmp_b + (4 << 20)
        vmem_limit = int(min(max(est, 16 << 20), 64 << 20))

        out = pl.pallas_call(
            kernel,
            out_shape=jax.ShapeDtypeStruct((N, out_ch, mh, mw), jnp.float32),
            grid_spec=pltpu.PrefetchScalarGridSpec(
                num_scalar_prefetch=0,
                grid=(N,),
                in_specs=in_specs,
                out_specs=out_spec,
                scratch_shapes=[
                    pltpu.VMEM((h4 + 2, nf * cpl, w4 + 2), jnp.bfloat16),   # pad scratch
                    pltpu.VMEM((h4, K, w4), jnp.bfloat16)]),                # im2col scratch
            compiler_params=pltpu.CompilerParams(
                dimension_semantics=("parallel",),
                vmem_limit_bytes=vmem_limit),
        )(*x_bf16, self.w1_bf16, *rh, *rw_t, self.w9_bf16, self.bias_col, rhf, rwf_t)
        return out


# --------------------------- pure-JAX f32 reference --------------------------

def _reference_forward(head, inputs, mask_size):
    """f32 reference matching the PyTorch module order (conv1x1 -> resize -> concat ->
    conv3x3 + bias -> ReLU -> resize), using the same bilinear-weight matrices."""
    mh, mw = int(mask_size[0]), int(mask_size[1])
    h4, w4 = mh // 4, mw // 4
    outs = []
    for i, x in enumerate(inputs):
        _, _, H, W = x.shape
        y = jnp.einsum('oc,nchw->nohw', head.w1_f32[i], x)
        rhm = jnp.asarray(_resize_matrix(h4, H))
        rwm = jnp.asarray(_resize_matrix(w4, W))
        y = jnp.einsum('yh,nohw->noyw', rhm, y)
        outs.append(jnp.einsum('xw,noyw->noyx', rwm, y))
    cat = jnp.concatenate(outs, axis=1)
    catp = jnp.pad(cat, ((0, 0), (0, 0), (1, 1), (1, 1)))
    conv = jnp.zeros((cat.shape[0], head.out_ch, h4, w4), jnp.float32)
    for ky in range(3):
        for kx in range(3):
            conv = conv + jnp.einsum('oc,nchw->nohw', head.depth_w_f32[:, :, ky, kx],
                                     catp[:, :, ky:ky + h4, kx:kx + w4])
    conv = jax.nn.relu(conv + head.depth_b_f32[None, :, None, None])
    rhfm = jnp.asarray(_resize_matrix(mh, h4))
    rwfm = jnp.asarray(_resize_matrix(mw, w4))
    out = jnp.einsum('yh,nohw->noyw', rhfm, conv)
    return jnp.einsum('xw,noyw->noyx', rwfm, out)


# ----------------------------------- main ------------------------------------

if __name__ == "__main__":
    key = jax.random.PRNGKey(0)
    k_in1, k_in2, k_params = jax.random.split(key, 3)

    in_planes, out_planes, num_features, out_ch = 4, 4, 2, 1
    N = 2
    cin = in_planes * 4          # 16
    mask_size = (32, 32)

    # Two pyramid features at different resolutions (NCHW), as the module expects.
    inputs = [jax.random.normal(k_in1, (N, cin, 16, 16), jnp.float32),
              jax.random.normal(k_in2, (N, cin, 8, 8), jnp.float32)]

    head = DepthHeadPallas(in_planes, out_planes, num_features, out_ch, k_params)
    out = jax.block_until_ready(head(inputs, mask_size))

    assert out.shape == (N, out_ch, mask_size[0], mask_size[1]), out.shape
    assert bool(jnp.all(jnp.isfinite(out)))

    ref = jax.block_until_ready(_reference_forward(head, inputs, mask_size))
    err = float(jnp.max(jnp.abs(out - ref)))
    assert err < 0.15, f"max abs error vs f32 reference: {err}"
    print("KERNEL_OK")
</pallas_src>

<mosaic_0001>
module attributes {stable_mosaic.version = 11 : i64} {
  func.func @kernel(%arg0: i32, %arg1: memref<1x16x16x16xbf16, #tpu.memory_space<vmem>>, %arg2: memref<1x16x8x8xbf16, #tpu.memory_space<vmem>>, %arg3: memref<2x4x16xbf16, #tpu.memory_space<vmem>>, %arg4: memref<8x16xbf16, #tpu.memory_space<vmem>>, %arg5: memref<8x8xbf16, #tpu.memory_space<vmem>>, %arg6: memref<16x8xbf16, #tpu.memory_space<vmem>>, %arg7: memref<8x8xbf16, #tpu.memory_space<vmem>>, %arg8: memref<1x72xbf16, #tpu.memory_space<vmem>>, %arg9: memref<1x1xf32, #tpu.memory_space<vmem>>, %arg10: memref<32x8xbf16, #tpu.memory_space<vmem>>, %arg11: memref<8x32xbf16, #tpu.memory_space<vmem>>, %arg12: memref<1x1x32x32xf32, #tpu.memory_space<vmem>>, %arg13: memref<10x8x10xbf16, #tpu.memory_space<vmem>>, %arg14: memref<8x72x8xbf16, #tpu.memory_space<vmem>>) attributes {dimension_semantics = [#tpu.dimension_semantics<parallel>], iteration_bounds = array<i64: 2>, scalar_prefetch = 0 : i64, scratch_operands = 2 : i64, tpu.core_type = #tpu.core_type<tc>, window_params = [{transform_indices = @transform_0, window_bounds = array<i64: 1, 16, 16, 16>}, {transform_indices = @transform_1, window_bounds = array<i64: 1, 16, 8, 8>}, {pipeline_mode = #tpu.pipeline_mode<synchronous>, transform_indices = @transform_2, window_bounds = array<i64: 2, 4, 16>}, {pipeline_mode = #tpu.pipeline_mode<synchronous>, transform_indices = @transform_3, window_bounds = array<i64: 8, 16>}, {pipeline_mode = #tpu.pipeline_mode<synchronous>, transform_indices = @transform_4, window_bounds = array<i64: 8, 8>}, {pipeline_mode = #tpu.pipeline_mode<synchronous>, transform_indices = @transform_5, window_bounds = array<i64: 16, 8>}, {pipeline_mode = #tpu.pipeline_mode<synchronous>, transform_indices = @transform_6, window_bounds = array<i64: 8, 8>}, {pipeline_mode = #tpu.pipeline_mode<synchronous>, transform_indices = @transform_7, window_bounds = array<i64: 1, 72>}, {pipeline_mode = #tpu.pipeline_mode<synchronous>, transform_indices = @transform_8, window_bounds = array<i64: 1, 1>}, {pipeline_mode = #tpu.pipeline_mode<synchronous>, transform_indices = @transform_9, window_bounds = array<i64: 32, 8>}, {pipeline_mode = #tpu.pipeline_mode<synchronous>, transform_indices = @transform_10, window_bounds = array<i64: 8, 32>}, {transform_indices = @transform_11, window_bounds = array<i64: 1, 1, 32, 32>}]} {
    %cst = arith.constant 0.000000e+00 : bf16
    %0 = vector.broadcast %cst : bf16 to vector<1x8x10xbf16>
    %c0 = arith.constant 0 : index
    %c0_0 = arith.constant 0 : index
    %c0_1 = arith.constant 0 : index
    %1 = vector.load %arg13[%c0, %c0_0, %c0_1] : memref<10x8x10xbf16, #tpu.memory_space<vmem>>, vector<1x8x10xbf16>
    tpu.vector_store %arg13[%c0, %c0_0, %c0_1], %0 {strides = array<i32>} : memref<10x8x10xbf16, #tpu.memory_space<vmem>>, vector<1x8x10xbf16>,
    %c9 = arith.constant 9 : index
    %c0_2 = arith.constant 0 : index
    %c0_3 = arith.constant 0 : index
    %2 = vector.load %arg13[%c9, %c0_2, %c0_3] : memref<10x8x10xbf16, #tpu.memory_space<vmem>>, vector<1x8x10xbf16>
    tpu.vector_store %arg13[%c9, %c0_2, %c0_3], %0 {strides = array<i32>} : memref<10x8x10xbf16, #tpu.memory_space<vmem>>, vector<1x8x10xbf16>,
    %cst_4 = arith.constant 0.000000e+00 : bf16
    %3 = vector.broadcast %cst_4 : bf16 to vector<10x8x1xbf16>
    %c0_5 = arith.constant 0 : index
    %c0_6 = arith.constant 0 : index
    %c0_7 = arith.constant 0 : index
    %4 = vector.load %arg13[%c0_5, %c0_6, %c0_7] : memref<10x8x10xbf16, #tpu.memory_space<vmem>>, vector<10x8x1xbf16>
    tpu.vector_store %arg13[%c0_5, %c0_6, %c0_7], %3 {strides = array<i32>} : memref<10x8x10xbf16, #tpu.memory_space<vmem>>, vector<10x8x1xbf16>,
    %c0_8 = arith.constant 0 : index
    %c0_9 = arith.constant 0 : index
    %c9_10 = arith.constant 9 : index
    %5 = vector.load %arg13[%c0_8, %c0_9, %c9_10] : memref<10x8x10xbf16, #tpu.memory_space<vmem>>, vector<10x8x1xbf16>
    tpu.vector_store %arg13[%c0_8, %c0_9, %c9_10], %3 {strides = array<i32>} : memref<10x8x10xbf16, #tpu.memory_space<vmem>>, vector<10x8x1xbf16>,
    %c0_11 = arith.constant 0 : index
    %c0_12 = arith.constant 0 : index
    %c0_13 = arith.constant 0 : index
    %c0_14 = arith.constant 0 : index
    %6 = vector.load %arg1[%c0_11, %c0_12, %c0_13, %c0_14] : memref<1x16x16x16xbf16, #tpu.memory_space<vmem>>, vector<1x16x16x16xbf16>
    %7 = vector.shape_cast %6 : vector<1x16x16x16xbf16> to vector<16x16x16xbf16>
    %8 = vector.shape_cast %7 : vector<16x16x16xbf16> to vector<256x16xbf16>
    %c0_15 = arith.constant 0 : index
    %c0_16 = arith.constant 0 : index
    %9 = vector.load %arg6[%c0_15, %c0_16] : memref<16x8xbf16, #tpu.memory_space<vmem>>, vector<16x8xbf16>
    %cst_17 = arith.constant dense<0.000000e+00> : vector<256x8xf32>
    %10 = tpu.matmul %8, %9, %cst_17 {dimension_numbers = #tpu.dot_dimension_numbers<[1], [0], [0], [1], [0, 0, 1, 1], [], []>} : vector<256x16xbf16>, vector<16x8xbf16>, vector<256x8xf32> -> vector<256x8xf32>
    %11 = vector.shape_cast %10 : vector<256x8xf32> to vector<16x16x8xf32>
    %12 = arith.truncf %11 : vector<16x16x8xf32> to vector<16x16x8xbf16>
    %c0_18 = arith.constant 0 : index
    %c0_19 = arith.constant 0 : index
    %13 = vector.load %arg4[%c0_18, %c0_19] : memref<8x16xbf16, #tpu.memory_space<vmem>>, vector<8x16xbf16>
    %14 = vector.shape_cast %13 : vector<8x16xbf16> to vector<1x8x16xbf16>
    %15 = vector.shape_cast %14 : vector<1x8x16xbf16> to vector<1x8x16xbf16>
    %16 = vector.broadcast %15 : vector<1x8x16xbf16> to vector<16x8x16xbf16>
    "tpu.trace_start"() <{level = 10 : i32, message = "bij,bjk->bik"}> : () -> ()
    %cst_20 = arith.constant dense<0.000000e+00> : vector<16x8x8xf32>
    %17 = tpu.matmul %16, %12, %cst_20 {dimension_numbers = #tpu.dot_dimension_numbers<[2], [1], [1], [2], [0, 0, 0, 1, 1, 2], [0], [0]>} : vector<16x8x16xbf16>, vector<16x16x8xbf16>, vector<16x8x8xf32> -> vector<16x8x8xf32>
    "tpu.trace_stop"() : () -> ()
    %18 = tpu.transpose %17, [1, 0, 2] : vector<16x8x8xf32> -> vector<8x16x8xf32>
    %19 = arith.truncf %18 : vector<8x16x8xf32> to vector<8x16x8xbf16>
    %c0_21 = arith.constant 0 : index
    %c0_22 = arith.constant 0 : index
    %c0_23 = arith.constant 0 : index
    %20 = vector.load %arg3[%c0_21, %c0_22, %c0_23] : memref<2x4x16xbf16, #tpu.memory_space<vmem>>, vector<1x4x16xbf16>
    %21 = vector.shape_cast %20 : vector<1x4x16xbf16> to vector<4x16xbf16>
    %22 = vector.shape_cast %21 : vector<4x16xbf16> to vector<1x4x16xbf16>
    %23 = vector.shape_cast %22 : vector<1x4x16xbf16> to vector<1x4x16xbf16>
    %24 = vector.broadcast %23 : vector<1x4x16xbf16> to vector<8x4x16xbf16>
    "tpu.trace_start"() <{level = 10 : i32, message = "bij,bjk->bik"}> : () -> ()
    %cst_24 = arith.constant dense<0.000000e+00> : vector<8x4x8xf32>
    %25 = tpu.matmul %24, %19, %cst_24 {dimension_numbers = #tpu.dot_dimension_numbers<[2], [1], [1], [2], [0, 0, 0, 1, 1, 2], [0], [0]>} : vector<8x4x16xbf16>, vector<8x16x8xbf16>, vector<8x4x8xf32> -> vector<8x4x8xf32>
    "tpu.trace_stop"() : () -> ()
    %26 = arith.truncf %25 : vector<8x4x8xf32> to vector<8x4x8xbf16>
    %c1 = arith.constant 1 : index
    %c0_25 = arith.constant 0 : index
    %c1_26 = arith.constant 1 : index
    %27 = vector.load %arg13[%c1, %c0_25, %c1_26] : memref<10x8x10xbf16, #tpu.memory_space<vmem>>, vector<8x4x8xbf16>
    tpu.vector_store %arg13[%c1, %c0_25, %c1_26], %26 {strides = array<i32>} : memref<10x8x10xbf16, #tpu.memory_space<vmem>>, vector<8x4x8xbf16>,
    %c0_27 = arith.constant 0 : index
    %c0_28 = arith.constant 0 : index
    %c0_29 = arith.constant 0 : index
    %c0_30 = arith.constant 0 : index
    %28 = vector.load %arg2[%c0_27, %c0_28, %c0_29, %c0_30] : memref<1x16x8x8xbf16, #tpu.memory_space<vmem>>, vector<1x16x8x8xbf16>
    %29 = vector.shape_cast %28 : vector<1x16x8x8xbf16> to vector<16x8x8xbf16>
    %30 = vector.shape_cast %29 : vector<16x8x8xbf16> to vector<128x8xbf16>
    %c0_31 = arith.constant 0 : index
    %c0_32 = arith.constant 0 : index
    %31 = vector.load %arg7[%c0_31, %c0_32] : memref<8x8xbf16, #tpu.memory_space<vmem>>, vector<8x8xbf16>
    %cst_33 = arith.constant dense<0.000000e+00> : vector<128x8xf32>
    %32 = tpu.matmul %30, %31, %cst_33 {dimension_numbers = #tpu.dot_dimension_numbers<[1], [0], [0], [1], [0, 0, 1, 1], [], []>} : vector<128x8xbf16>, vector<8x8xbf16>, vector<128x8xf32> -> vector<128x8xf32>
    %33 = vector.shape_cast %32 : vector<128x8xf32> to vector<16x8x8xf32>
    %34 = arith.truncf %33 : vector<16x8x8xf32> to vector<16x8x8xbf16>
    %c0_34 = arith.constant 0 : index
    %c0_35 = arith.constant 0 : index
    %35 = vector.load %arg5[%c0_34, %c0_35] : memref<8x8xbf16, #tpu.memory_space<vmem>>, vector<8x8xbf16>
    %36 = vector.shape_cast %35 : vector<8x8xbf16> to vector<1x8x8xbf16>
    %37 = vector.shape_cast %36 : vector<1x8x8xbf16> to vector<1x8x8xbf16>
    %38 = vector.broadcast %37 : vector<1x8x8xbf16> to vector<16x8x8xbf16>
    "tpu.trace_start"() <{level = 10 : i32, message = "bij,bjk->bik"}> : () -> ()
    %cst_36 = arith.constant dense<0.000000e+00> : vector<16x8x8xf32>
    %39 = tpu.matmul %38, %34, %cst_36 {dimension_numbers = #tpu.dot_dimension_numbers<[2], [1], [1], [2], [0, 0, 0, 1, 1, 2], [0], [0]>} : vector<16x8x8xbf16>, vector<16x8x8xbf16>, vector<16x8x8xf32> -> vector<16x8x8xf32>
    "tpu.trace_stop"() : () -> ()
    %40 = tpu.transpose %39, [1, 0, 2] : vector<16x8x8xf32> -> vector<8x16x8xf32>
    %41 = arith.truncf %40 : vector<8x16x8xf32> to vector<8x16x8xbf16>
    %c1_37 = arith.constant 1 : index
    %c0_38 = arith.constant 0 : index
    %c0_39 = arith.constant 0 : index
    %42 = vector.load %arg3[%c1_37, %c0_38, %c0_39] : memref<2x4x16xbf16, #tpu.memory_space<vmem>>, vector<1x4x16xbf16>
    %43 = vector.shape_cast %42 : vector<1x4x16xbf16> to vector<4x16xbf16>
    %44 = vector.shape_cast %43 : vector<4x16xbf16> to vector<1x4x16xbf16>
    %45 = vector.shape_cast %44 : vector<1x4x16xbf16> to vector<1x4x16xbf16>
    %46 = vector.broadcast %45 : vector<1x4x16xbf16> to vector<8x4x16xbf16>
    "tpu.trace_start"() <{level = 10 : i32, message = "bij,bjk->bik"}> : () -> ()
    %cst_40 = arith.constant dense<0.000000e+00> : vector<8x4x8xf32>
    %47 = tpu.matmul %46, %41, %cst_40 {dimension_numbers = #tpu.dot_dimension_numbers<[2], [1], [1], [2], [0, 0, 0, 1, 1, 2], [0], [0]>} : vector<8x4x16xbf16>, vector<8x16x8xbf16>, vector<8x4x8xf32> -> vector<8x4x8xf32>
    "tpu.trace_stop"() : () -> ()
    %48 = arith.truncf %47 : vector<8x4x8xf32> to vector<8x4x8xbf16>
    %c1_41 = arith.constant 1 : index
    %c4 = arith.constant 4 : index
    %c1_42 = arith.constant 1 : index
    %49 = vector.load %arg13[%c1_41, %c4, %c1_42] : memref<10x8x10xbf16, #tpu.memory_space<vmem>>, vector<8x4x8xbf16>
    tpu.vector_store %arg13[%c1_41, %c4, %c1_42], %48 {strides = array<i32>} : memref<10x8x10xbf16, #tpu.memory_space<vmem>>, vector<8x4x8xbf16>,
    %c0_43 = arith.constant 0 : index
    %c0_44 = arith.constant 0 : index
    %c0_45 = arith.constant 0 : index
    %50 = vector.load %arg13[%c0_43, %c0_44, %c0_45] : memref<10x8x10xbf16, #tpu.memory_space<vmem>>, vector<8x8x8xbf16>
    %c0_46 = arith.constant 0 : index
    %c0_47 = arith.constant 0 : index
    %c0_48 = arith.constant 0 : index
    %51 = vector.load %arg14[%c0_46, %c0_47, %c0_48] : memref<8x72x8xbf16, #tpu.memory_space<vmem>>, vector<8x8x8xbf16>
    tpu.vector_store %arg14[%c0_46, %c0_47, %c0_48], %50 {strides = array<i32>} : memref<8x72x8xbf16, #tpu.memory_space<vmem>>, vector<8x8x8xbf16>,
    %c0_49 = arith.constant 0 : index
    %c0_50 = arith.constant 0 : index
    %c1_51 = arith.constant 1 : index
    %52 = vector.load %arg13[%c0_49, %c0_50, %c1_51] : memref<10x8x10xbf16, #tpu.memory_space<vmem>>, vector<8x8x8xbf16>
    %c0_52 = arith.constant 0 : index
    %c8 = arith.constant 8 : index
    %c0_53 = arith.constant 0 : index
    %53 = vector.load %arg14[%c0_52, %c8, %c0_53] : memref<8x72x8xbf16, #tpu.memory_space<vmem>>, vector<8x8x8xbf16>
    tpu.vector_store %arg14[%c0_52, %c8, %c0_53], %52 {strides = array<i32>} : memref<8x72x8xbf16, #tpu.memory_space<vmem>>, vector<8x8x8xbf16>,
    %c0_54 = arith.constant 0 : index
    %c0_55 = arith.constant 0 : index
    %c2 = arith.constant 2 : index
    %54 = vector.load %arg13[%c0_54, %c0_55, %c2] : memref<10x8x10xbf16, #tpu.memory_space<vmem>>, vector<8x8x8xbf16>
    %c0_56 = arith.constant 0 : index
    %c16 = arith.constant 16 : index
    %c0_57 = arith.constant 0 : index
    %55 = vector.load %arg14[%c0_56, %c16, %c0_57] : memref<8x72x8xbf16, #tpu.memory_space<vmem>>, vector<8x8x8xbf16>
    tpu.vector_store %arg14[%c0_56, %c16, %c0_57], %54 {strides = array<i32>} : memref<8x72x8xbf16, #tpu.memory_space<vmem>>, vector<8x8x8xbf16>,
    %c1_58 = arith.constant 1 : index
    %c0_59 = arith.constant 0 : index
    %c0_60 = arith.constant 0 : index
    %56 = vector.load %arg13[%c1_58, %c0_59, %c0_60] : memref<10x8x10xbf16, #tpu.memory_space<vmem>>, vector<8x8x8xbf16>
    %c0_61 = arith.constant 0 : index
    %c24 = arith.constant 24 : index
    %c0_62 = arith.constant 0 : index
    %57 = vector.load %arg14[%c0_61, %c24, %c0_62] : memref<8x72x8xbf16, #tpu.memory_space<vmem>>, vector<8x8x8xbf16>
    tpu.vector_store %arg14[%c0_61, %c24, %c0_62], %56 {strides = array<i32>} : memref<8x72x8xbf16, #tpu.memory_space<vmem>>, vector<8x8x8xbf16>,
    %c1_63 = arith.constant 1 : index
    %c0_64 = arith.constant 0 : index
    %c1_65 = arith.constant 1 : index
    %58 = vector.load %arg13[%c1_63, %c0_64, %c1_65] : memref<10x8x10xbf16, #tpu.memory_space<vmem>>, vector<8x8x8xbf16>
    %c0_66 = arith.constant 0 : index
    %c32 = arith.constant 32 : index
    %c0_67 = arith.constant 0 : index
    %59 = vector.load %arg14[%c0_66, %c32, %c0_67] : memref<8x72x8xbf16, #tpu.memory_space<vmem>>, vector<8x8x8xbf16>
    tpu.vector_store %arg14[%c0_66, %c32, %c0_67], %58 {strides = array<i32>} : memref<8x72x8xbf16, #tpu.memory_space<vmem>>, vector<8x8x8xbf16>,
    %c1_68 = arith.constant 1 : index
    %c0_69 = arith.constant 0 : index
    %c2_70 = arith.constant 2 : index
    %60 = vector.load %arg13[%c1_68, %c0_69, %c2_70] : memref<10x8x10xbf16, #tpu.memory_space<vmem>>, vector<8x8x8xbf16>
    %c0_71 = arith.constant 0 : index
    %c40 = arith.constant 40 : index
    %c0_72 = arith.constant 0 : index
    %61 = vector.load %arg14[%c0_71, %c40, %c0_72] : memref<8x72x8xbf16, #tpu.memory_space<vmem>>, vector<8x8x8xbf16>
    tpu.vector_store %arg14[%c0_71, %c40, %c0_72], %60 {strides = array<i32>} : memref<8x72x8xbf16, #tpu.memory_space<vmem>>, vector<8x8x8xbf16>,
    %c2_73 = arith.constant 2 : index
    %c0_74 = arith.constant 0 : index
    %c0_75 = arith.constant 0 : index
    %62 = vector.load %arg13[%c2_73, %c0_74, %c0_75] : memref<10x8x10xbf16, #tpu.memory_space<vmem>>, vector<8x8x8xbf16>
    %c0_76 = arith.constant 0 : index
    %c48 = arith.constant 48 : index
    %c0_77 = arith.constant 0 : index
    %63 = vector.load %arg14[%c0_76, %c48, %c0_77] : memref<8x72x8xbf16, #tpu.memory_space<vmem>>, vector<8x8x8xbf16>
    tpu.vector_store %arg14[%c0_76, %c48, %c0_77], %62 {strides = array<i32>} : memref<8x72x8xbf16, #tpu.memory_space<vmem>>, vector<8x8x8xbf16>,
    %c2_78 = arith.constant 2 : index
    %c0_79 = arith.constant 0 : index
    %c1_80 = arith.constant 1 : index
    %64 = vector.load %arg13[%c2_78, %c0_79, %c1_80] : memref<10x8x10xbf16, #tpu.memory_space<vmem>>, vector<8x8x8xbf16>
    %c0_81 = arith.constant 0 : index
    %c56 = arith.constant 56 : index
    %c0_82 = arith.constant 0 : index
    %65 = vector.load %arg14[%c0_81, %c56, %c0_82] : memref<8x72x8xbf16, #tpu.memory_space<vmem>>, vector<8x8x8xbf16>
    tpu.vector_store %arg14[%c0_81, %c56, %c0_82], %64 {strides = array<i32>} : memref<8x72x8xbf16, #tpu.memory_space<vmem>>, vector<8x8x8xbf16>,
    %c2_83 = arith.constant 2 : index
    %c0_84 = arith.constant 0 : index
    %c2_85 = arith.constant 2 : index
    %66 = vector.load %arg13[%c2_83, %c0_84, %c2_85] : memref<10x8x10xbf16, #tpu.memory_space<vmem>>, vector<8x8x8xbf16>
    %c0_86 = arith.constant 0 : index
    %c64 = arith.constant 64 : index
    %c0_87 = arith.constant 0 : index
    %67 = vector.load %arg14[%c0_86, %c64, %c0_87] : memref<8x72x8xbf16, #tpu.memory_space<vmem>>, vector<8x8x8xbf16>
    tpu.vector_store %arg14[%c0_86, %c64, %c0_87], %66 {strides = array<i32>} : memref<8x72x8xbf16, #tpu.memory_space<vmem>>, vector<8x8x8xbf16>,
    %c0_88 = arith.constant 0 : index
    %c0_89 = arith.constant 0 : index
    %68 = vector.load %arg8[%c0_88, %c0_89] : memref<1x72xbf16, #tpu.memory_space<vmem>>, vector<1x72xbf16>
    %69 = vector.shape_cast %68 : vector<1x72xbf16> to vector<1x1x72xbf16>
    %70 = vector.shape_cast %69 : vector<1x1x72xbf16> to vector<1x1x72xbf16>
    %71 = vector.broadcast %70 : vector<1x1x72xbf16> to vector<8x1x72xbf16>
    %c0_90 = arith.constant 0 : index
    %c0_91 = arith.constant 0 : index
    %c0_92 = arith.constant 0 : index
    %72 = vector.load %arg14[%c0_90, %c0_91, %c0_92] : memref<8x72x8xbf16, #tpu.memory_space<vmem>>, vector<8x72x8xbf16>
    "tpu.trace_start"() <{level = 10 : i32, message = "bij,bjk->bik"}> : () -> ()
    %cst_93 = arith.constant dense<0.000000e+00> : vector<8x1x8xf32>
    %73 = tpu.matmul %71, %72, %cst_93 {dimension_numbers = #tpu.dot_dimension_numbers<[2], [1], [1], [2], [0, 0, 0, 1, 1, 2], [0], [0]>} : vector<8x1x72xbf16>, vector<8x72x8xbf16>, vector<8x1x8xf32> -> vector<8x1x8xf32>
    "tpu.trace_stop"() : () -> ()
    %c0_94 = arith.constant 0 : index
    %c0_95 = arith.constant 0 : index
    %74 = vector.load %arg9[%c0_94, %c0_95] : memref<1x1xf32, #tpu.memory_space<vmem>>, vector<1x1xf32>
    %75 = vector.shape_cast %74 : vector<1x1xf32> to vector<1x1x1xf32>
    %76 = vector.broadcast %75 : vector<1x1x1xf32> to vector<8x1x8xf32>
    %77 = arith.addf %73, %76 : vector<8x1x8xf32>
    %cst_96 = arith.constant 0.000000e+00 : f32
    %78 = vector.broadcast %cst_96 : f32 to vector<8x1x8xf32>
    %79 = arith.maximumf %77, %78 : vector<8x1x8xf32>
    %80 = tpu.transpose %79, [1, 0, 2] : vector<8x1x8xf32> -> vector<1x8x8xf32>
    %81 = arith.truncf %80 : vector<1x8x8xf32> to vector<1x8x8xbf16>
    %c0_97 = arith.constant 0 : index
    %c0_98 = arith.constant 0 : index
    %82 = vector.load %arg10[%c0_97, %c0_98] : memref<32x8xbf16, #tpu.memory_space<vmem>>, vector<32x8xbf16>
    %83 = vector.shape_cast %82 : vector<32x8xbf16> to vector<1x32x8xbf16>
    "tpu.trace_start"() <{level = 10 : i32, message = "bij,bjk->bik"}> : () -> ()
    %cst_99 = arith.constant dense<0.000000e+00> : vector<1x32x8xf32>
    %84 = tpu.matmul %83, %81, %cst_99 {dimension_numbers = #tpu.dot_dimension_numbers<[2], [1], [1], [2], [0, 0, 0, 1, 1, 2], [0], [0]>} : vector<1x32x8xbf16>, vector<1x8x8xbf16>, vector<1x32x8xf32> -> vector<1x32x8xf32>
    "tpu.trace_stop"() : () -> ()
    %85 = vector.shape_cast %84 : vector<1x32x8xf32> to vector<32x8xf32>
    %86 = arith.truncf %85 : vector<32x8xf32> to vector<32x8xbf16>
    %c0_100 = arith.constant 0 : index
    %c0_101 = arith.constant 0 : index
    %87 = vector.load %arg11[%c0_100, %c0_101] : memref<8x32xbf16, #tpu.memory_space<vmem>>, vector<8x32xbf16>
    %cst_102 = arith.constant dense<0.000000e+00> : vector<32x32xf32>
    %88 = tpu.matmul %86, %87, %cst_102 {dimension_numbers = #tpu.dot_dimension_numbers<[1], [0], [0], [1], [0, 0, 1, 1], [], []>} : vector<32x8xbf16>, vector<8x32xbf16>, vector<32x32xf32> -> vector<32x32xf32>
    %89 = vector.shape_cast %88 : vector<32x32xf32> to vector<1x32x32xf32>
    %c0_103 = arith.constant 0 : index
    %c0_104 = arith.constant 0 : index
    %c0_105 = arith.constant 0 : index
    %c0_106 = arith.constant 0 : index
    %90 = vector.load %arg12[%c0_103, %c0_104, %c0_105, %c0_106] : memref<1x1x32x32xf32, #tpu.memory_space<vmem>>, vector<1x1x32x32xf32>
    %91 = vector.shape_cast %90 : vector<1x1x32x32xf32> to vector<1x32x32xf32>
    %92 = vector.shape_cast %89 : vector<1x32x32xf32> to vector<1x1x32x32xf32>
    tpu.vector_store %arg12[%c0_103, %c0_104, %c0_105, %c0_106], %92 {strides = array<i32>} : memref<1x1x32x32xf32, #tpu.memory_space<vmem>>, vector<1x1x32x32xf32>,
    return
  }
  func.func @transform_0(%arg0: i32) -> (i32, i32, i32, i32) {
    %c0_i32 = arith.constant 0 : i32
    %c0_i32_0 = arith.constant 0 : i32
    %c0_i32_1 = arith.constant 0 : i32
    %c0_i32_2 = arith.constant 0 : i32
    return %arg0, %c0_i32, %c0_i32_0, %c0_i32_1 : i32, i32, i32, i32
  }
  func.func @transform_1(%arg0: i32) -> (i32, i32, i32, i32) {
    %c0_i32 = arith.constant 0 : i32
    %c0_i32_0 = arith.constant 0 : i32
    %c0_i32_1 = arith.constant 0 : i32
    %c0_i32_2 = arith.constant 0 : i32
    return %arg0, %c0_i32, %c0_i32_0, %c0_i32_1 : i32, i32, i32, i32
  }
  func.func @transform_2(%arg0: i32) -> (i32, i32, i32) {
    %c0_i32 = arith.constant 0 : i32
    %c0_i32_0 = arith.constant 0 : i32
    %c0_i32_1 = arith.constant 0 : i32
    %c0_i32_2 = arith.constant 0 : i32
    return %c0_i32, %c0_i32_0, %c0_i32_1 : i32, i32, i32
  }
  func.func @transform_3(%arg0: i32) -> (i32, i32) {
    %c0_i32 = arith.constant 0 : i32
    %c0_i32_0 = arith.constant 0 : i32
    %c0_i32_1 = arith.constant 0 : i32
    return %c0_i32, %c0_i32_0 : i32, i32
  }
  func.func @transform_4(%arg0: i32) -> (i32, i32) {
    %c0_i32 = arith.constant 0 : i32
    %c0_i32_0 = arith.constant 0 : i32
    %c0_i32_1 = arith.constant 0 : i32
    return %c0_i32, %c0_i32_0 : i32, i32
  }
  func.func @transform_5(%arg0: i32) -> (i32, i32) {
    %c0_i32 = arith.constant 0 : i32
    %c0_i32_0 = arith.constant 0 : i32
    %c0_i32_1 = arith.constant 0 : i32
    return %c0_i32, %c0_i32_0 : i32, i32
  }
  func.func @transform_6(%arg0: i32) -> (i32, i32) {
    %c0_i32 = arith.constant 0 : i32
    %c0_i32_0 = arith.constant 0 : i32
    %c0_i32_1 = arith.constant 0 : i32
    return %c0_i32, %c0_i32_0 : i32, i32
  }
  func.func @transform_7(%arg0: i32) -> (i32, i32) {
    %c0_i32 = arith.constant 0 : i32
    %c0_i32_0 = arith.constant 0 : i32
    %c0_i32_1 = arith.constant 0 : i32
    return %c0_i32, %c0_i32_0 : i32, i32
  }
  func.func @transform_8(%arg0: i32) -> (i32, i32) {
    %c0_i32 = arith.constant 0 : i32
    %c0_i32_0 = arith.constant 0 : i32
    %c0_i32_1 = arith.constant 0 : i32
    return %c0_i32, %c0_i32_0 : i32, i32
  }
  func.func @transform_9(%arg0: i32) -> (i32, i32) {
    %c0_i32 = arith.constant 0 : i32
    %c0_i32_0 = arith.constant 0 : i32
    %c0_i32_1 = arith.constant 0 : i32
    return %c0_i32, %c0_i32_0 : i32, i32
  }
  func.func @transform_10(%arg0: i32) -> (i32, i32) {
    %c0_i32 = arith.constant 0 : i32
    %c0_i32_0 = arith.constant 0 : i32
    %c0_i32_1 = arith.constant 0 : i32
    return %c0_i32, %c0_i32_0 : i32, i32
  }
  func.func @transform_11(%arg0: i32) -> (i32, i32, i32, i32) {
    %c0_i32 = arith.constant 0 : i32
    %c0_i32_0 = arith.constant 0 : i32
    %c0_i32_1 = arith.constant 0 : i32
    %c0_i32_2 = arith.constant 0 : i32
    return %arg0, %c0_i32, %c0_i32_0, %c0_i32_1 : i32, i32, i32, i32
  }
}

</mosaic_0001>

<bundles_post_ra>
// kernel: tpu_custom_call.1
= control target key start
LH: loop header
LB: loop body
LE: loop exit
PB: predicated region body
PF: predicated region fallthrough
CT: control target
= control target key end

     0   :  { %s4754_s0 = inlined_call_operand.hbm [shape: bf16[2,16,16,16], index: 0, kind: input, shape index: {}]   ;;  %s4755_s1 = inlined_call_operand.vmem [shape: bf16[2,16,8,8], index: 1, kind: input, shape index: {}]   ;;  %s4756_s2 = inlined_call_operand.vmem [shape: bf16[2,4,16], index: 2, kind: input, shape index: {}]   ;;  %s4757_s3 = inlined_call_operand.vmem [shape: bf16[8,16], index: 3, kind: input, shape index: {}]   ;;  %s4758_s4 = inlined_call_operand.vmem [shape: bf16[8,8], index: 4, kind: input, shape index: {}]   ;;  %s4759_s5 = inlined_call_operand.vmem [shape: bf16[16,8], index: 5, kind: input, shape index: {}]   ;;  %s4760_s6 = inlined_call_operand.vmem [shape: bf16[8,8], index: 6, kind: input, shape index: {}]   ;;  %s4761_s7 = inlined_call_operand.vmem [shape: bf16[1,72], index: 7, kind: input, shape index: {}]   ;;  %s4762_s8 = inlined_call_operand.<no memory space> [shape: f32[1,1], index: 8, kind: input, shape index: {}]   ;;  %s4763_s9 = inlined_call_operand.vmem [shape: bf16[32,8], index: 9, kind: input, shape index: {}]   ;;  %s4764_s10 = inlined_call_operand.vmem [shape: bf16[8,32], index: 10, kind: input, shape index: {}]   ;;  %s4765_s11 = inlined_call_operand.hbm [shape: f32[2,1,32,32], index: 11, kind: output, shape index: {}]  }
   0x1   :  { %v16_v0 = vstv %s4762_s8 }
   0x2   :  { %17 = vst [vmem:[#allocation4] sm:$0x1] %v16_v0 }
   0x3   :  { %18 = vsyncpa [#allocation6], 0 }
   0x4   :  { %20 = vsyncpa [#allocation6 + $0x1], 0 }
   0x5   :  { %21 = vsyncpa [#allocation7], 0 }
   0x6   :  { %23 = vsyncpa [#allocation7 + $0x1], 0  ;;  %s3987_s19 = smov 0   ;;  %s3989_s20 = smov 0  }
   0x7   :  { %s3991_s21 = smov 0   ;;  %s3993_s22 = smov 0  }
   0x8 LB: > { %4770 = sst [smem:[#allocation11_spill]] %s3908_s21  ;;  %s4008_s8 = sadd.s32 4294967295, %s3912_s22   ;;  %s3912_s22 = sphi %s3993_s22, %s4781_s22   ;;  %s3908_s21 = sphi %s3991_s21, %s4783_s21   ;;  %s3904_s20 = sphi %s3989_s20, %s4785_s20   ;;  %s3900_s19 = sphi %s3987_s19, %s4784_s19  }
   0x9   : > { %s3358_s23 = sadd.s32 4294967294, %s3912_s22   ;;  %s4012_s24 = sadd.s32 1, %s3912_s22  }
   0xa   : > { %4771 = sst [smem:[#allocation12_spill]] %s4012_s24  ;;  %s36_s25 = sadd.s32 1, %s3908_s21 }
   0xb   : > { %s33_s26 = ssub.s32 %s3912_s22, %s4012_s24  ;;  %p43_p0 = scmp.ne.s32.totalorder %s3908_s21, %s3904_s20 }
   0xc   : > { %p34_p1 = scmp.eq.s32.totalorder %s33_s26, 0  ;;  %p44_p2 = scmp.eq.s32.totalorder %s3912_s22, 0 }
   0xd   : > { %p49_p3 = scmp.ne.s32.totalorder %s3904_s20, %s3900_s19  ;;  %p50_p4 = scmp.eq.s32.totalorder %s4008_s8, 0 }
   0xe   : > { %s4024_s27 = scalar_select %p34_p1, %s3908_s21, %s36_s25  }
   0xf   : > { %p4026_p5 = por %p44_p2, %p43_p0  ;;  %p4030_p6 = por %p50_p4, %p49_p3 }
  0x10   : > { %4772 = sst [smem:[#allocation13_spill]] %s4024_s27  ;;  %p288_p7 = scmp.eq.s32.totalorder %s4008_s8, 1 }
  0x11   : > { %p294_p8 = scmp.eq.s32.totalorder %s3358_s23, 1  ;;  %p3770_p10 = scmp.lt.s32.totalorder %s3912_s22, 2 }
  0x12   : > { %p4037_p11 = por %p288_p7, %p43_p0  ;;  %s341_s13 = sand.u32 1, %s3908_s21  }
  0x13   : > { %p4041_p12 = por %p294_p8, %p49_p3  ;;  %s3695_s14 = sshll.u32 %s3912_s22, 7 }
  0x14   : > { %s3361_s15 = sshll.u32 %s341_s13, 7  ;;  %s350_s18 = scalar_lea.hbm %s4754_s0, %s3695_s14 }
  0x15   : > { %s4776_s12 = scalar_select %p4041_p12, 1, 0 }
  0x16   : > { %s351_s25 = sshll.u32 %s350_s18, 4  ;;  %s345_s23 = scalar_lea.vmem [#allocation5], %s3361_s15  ;;  %s352_s25 = int_to_ptr.hbm [resolvable:$true] %s351_s25 }
  0x17   : > { %4777 = sst [smem:[#allocation14_spill]] %s4776_s12  ;;  %s353_s26 = sshll.u32 %s345_s23, 4  ;;  %s354_s26 = int_to_ptr.vmem [resolvable:$true] %s353_s26 }
  0x18   : > { %p4052_p13 = pnand %p3770_p10, %p4026_p5  ;;  %p3364_p0 = scmp.ge.s32.totalorder %s3912_s22, 1 }
  0x19   : > { %p369_p1 = scmp.lt.s32.totalorder %s3912_s22, 3  ;;  %s342_s21 = scalar_lea.sflag [#allocation6], %s341_s13 }
  0x1a   : > { %s3816_s24 = sshra.s32 %s352_s25, 4  ;;  %p3820_p3 = pneg %p4052_p13  ;;  %s3817_s24 = int_to_ptr.hbm [resolvable:$true] %s3816_s24 }
  0x1b   : > { %s3818_s12 = scalar_lea.hbm %s3817_s24, 128  ;;  %s3823_s28 = scalar_lea.hbm %s4754_s0, 256 }
  0x1c   : > { %p3819_p2 = scmp.ne.s32.totalorder %s3817_s24, %s3818_s12  ;;  %p3824_p5 = scmp.lt.s32.totalorder %s3817_s24, %s4754_s0 }
  0x1d   : > { %p3825_p8 = scmp.lt.s32.totalorder %s3823_s28, %s3818_s12 }
  0x1e   : > { %p3821_p4 = pnand %p3820_p3, %p3819_p2 }
  0x1f   : > { %p3826_p10 = por %p3825_p8, %p3824_p5 }
  0x20   : > { %p3822_p7 = pneg %p3821_p4 }
  0x22   : > { %p3827_p9 = pnand %p3826_p10, %p3822_p7 }
  0x24   : > { %3830 = shalt.err (!%p3827_p9)
}
  0x25   : > { %s3914_s13 = smov 64   ;;  %s3915_s18 = smov 4  }
  0x26   : > { %3765 = dma.hbm_to_vmem [thread:$0]  (!%p4052_p13), %s352_s25, 2048, %s354_s26, %s342_s21, %s3914_s13, %s3914_s13, %s3915_s18  }
  0x27   : > { %p370_p2 = pnand %p3364_p0, %p369_p1 }
  0x28   : > { %s4073_s23 = sand.u32 (!%p370_p2), 1, %s3904_s20  }
  0x29   : > { %373 = sbr.rel (%p370_p2) target bundleno = 1946 (0x79a), region = 64  ;;  %s3365_s24 = sshll.u32 (!%p370_p2), %s4073_s23, 7 }
  0x2a   : > { %s376_s12 = scalar_lea.sflag (!%p370_p2), [#allocation6], %s4073_s23  ;;  %s4077_s14 = scalar_lea.vmem (!%p370_p2), [#allocation5], %s3365_s24 }
  0x2e   : > { %3891 = dma.done.wait (%p4030_p6), %s376_s12, 2048  }
  0x2f   : > { %3893 = vsyncadd (%p4030_p6), %s376_s12, 4294965248  ;;  %v3713_v1 = vld [vmem:[%s4759_s5] sm:$0xff]  ;;  %v3697_v2 = vld [vmem:[%s4077_s14] sm:$0xff]  ;;  %vm576_vm0 = vcmask 130048   ;;  %vm1055_vm1 = vcmask 1047556   ;;  %vm1583_vm2 = vcmask 1043456  }
  0x30   : > { %632 = vmatpush.bf16.msra.mxu0 %v3713_v1  ;;  %3757 = vmatpush.bf16.msra.mxu2 %v3713_v1  ;;  %v3698_v3 = vld [vmem:[%s4077_s14 + $0x8] sm:$0xff]  ;;  %v3699_v4 = vld [vmem:[%s4077_s14 + $0x10] sm:$0xff]  ;;  %v3700_v5 = vld [vmem:[%s4077_s14 + $0x18] sm:$0xff]  ;;  %p424_p6 = scmp.lt.s32.totalorder %s4008_s8, 1  ;;  %vm1558_vm3 = vcmask 64512   ;;  %vm430_vm4 = vcmask 76800  }
  0x31   : > { %v3701_v6 = vld [vmem:[%s4077_s14 + $0x20] sm:$0xff]  ;;  %v3702_v7 = vld [vmem:[%s4077_s14 + $0x28] sm:$0xff]  ;;  %v3703_v8 = vld [vmem:[%s4077_s14 + $0x30] sm:$0xff]  ;;  %vm434_vm5 = vcmask 3072   ;;  %vm445_vm6 = vcmask 76872   ;;  %s3920_s21 = smov 127  }
  0x32   : > { %v3704_v9 = vld [vmem:[%s4077_s14 + $0x38] sm:$0xff]  ;;  %v3705_v10 = vld [vmem:[%s4077_s14 + $0x40] sm:$0xff]  ;;  %v3706_v18 = vld [vmem:[%s4077_s14 + $0x48] sm:$0xff]  ;;  %s425_s17 = scalar_select %p424_p6, %s4008_s8, 1  ;;  %vm2374_vm7 = vcmask 60416   ;;  %vm1492_vm8 = vcmask 66568  }
  0x33   : > { %3437 = vmatmul.msk.bf16.vlgmr.msra.gmra.mxu0 %vm576_vm0, %v3697_v2  ;;  %v3707_v26 = vld [vmem:[%s4077_s14 + $0x50] sm:$0xff]  ;;  %v3712_v34 = vld [vmem:[%s4077_s14 + $0x78] sm:$0xff]  ;;  %v3709_v44 = vld [vmem:[%s4077_s14 + $0x60] sm:$0xff]  ;;  %s3921_s27 = smov 1   ;;  %vm2357_vm9 = vcmask 68618   ;;  %vm2811_vm10 = vcmask 588800  }
  0x34   : > { %v3708_v35 = vld [vmem:[%s4077_s14 + $0x58] sm:$0xff]  ;;  %3452 = vmatmul.msk.bf16.vlgmr.msra.gmra.mxu2 %vm576_vm0, %v3712_v34  ;;  %v3710_v52 = vld [vmem:[%s4077_s14 + $0x68] sm:$0xff]  ;;  %v3711_v60 = vld [vmem:[%s4077_s14 + $0x70] sm:$0xff]  ;;  %s3696_s13 = sshll.u32 %s425_s17, 6  ;;  %s3919_s14 = smov 126   ;;  %vm3252_vm11 = vcmask 261120  }
  0x35   : > { %v4115_v43 = vld [vmem:[%s4757_s3] sm:$0xf]  ;;  %s4294_s12 = scalar_lea.vmem %s4755_s1, %s3696_s13  ;;  %s3756_s29 = sshll.u32 %s4008_s8, 5 }
  0x36   : > { %s3269_s15 = scalar_lea.hbm %s4765_s11, %s3756_s29  ;;  %s3258_s17 = scalar_lea.sflag [#allocation7], %s4073_s23 }
  0x37   : > { %s3272_s16 = sshll.u32 %s3269_s15, 4  ;;  %s3273_s16 = int_to_ptr.hbm [resolvable:$true] %s3272_s16 }
  0x38   : > { %s3860_s13 = sshra.s32 %s3273_s16, 4  ;;  %s3861_s13 = int_to_ptr.hbm [resolvable:$true] %s3860_s13 }
  0x39   : > { %s3862_s18 = scalar_lea.hbm %s3861_s13, 32  ;;  %p3867_p1 = scmp.lt.s32.totalorder %s3861_s13, %s4765_s11 }
  0x3a   : > { %p3863_p9 = scmp.ne.s32.totalorder %s3861_s13, %s3862_s18 }
  0x3c   : > { %p3864_p13 = pnand %p3863_p9, %p4037_p11 }
  0x3e   : > { %p3865_p0 = pneg %p3864_p13 }
  0x43   : > { %3438 = vmatmul.msk.bf16.gmra.mxu0 %vm576_vm0, %v3698_v3 }
  0x53   : > { %3439 = vmatmul.msk.bf16.gmra.mxu0 %vm576_vm0, %v3699_v4 }
  0x63   : > { %3440 = vmatmul.msk.bf16.gmra.mxu0 %vm576_vm0, %v3700_v5 }
  0x73   : > { %3441 = vmatmul.msk.bf16.gmra.mxu0 %vm576_vm0, %v3701_v6 }
  0x83   : > { %3442 = vmatmul.msk.bf16.gmra.mxu0 %vm576_vm0, %v3702_v7 }
  0x93   : > { %3443 = vmatmul.msk.bf16.gmra.mxu0 %vm576_vm0, %v3703_v8 }
  0xa3   : > { %3444 = vmatmul.msk.bf16.gmra.mxu0 %vm576_vm0, %v3704_v9 }
  0xb0   : > { %v634_v11 = vpop.f32.mrf.mxu0 }
  0xb1   : > { %v714_v12 = vpack.c.bf16 %v634_v11, %v634_v11 }
  0xb3   : > { %3445 = vmatmul.msk.bf16.gmra.mxu0 %vm576_vm0, %v3705_v10  ;;  %v749_v15 = vunpack.c.l.b16 %v714_v12 }
  0xb8   : > { %v636_v13 = vpop.f32.mrf.mxu0 }
  0xb9   : > { %v715_v14 = vpack.c.bf16 %v636_v13, %v636_v13 }
  0xbb   : > { %v750_v16 = vunpack.c.l.b16 %v715_v14 }
  0xbd   : > { %v751_v17 = vpack.c.b16 %v750_v16, %v749_v15 }
  0xbf   : > { %763 = vmatpush.bf16.msra.mxu3 %v751_v17 }
  0xc0   : > { %v639_v19 = vpop.f32.mrf.mxu0 }
  0xc1   : > { %v716_v20 = vpack.c.bf16 %v639_v19, %v639_v19 }
  0xc2   : > { %3453 = vmatmul.msk.bf16.vlgmr.msra.gmra.mxu3 %vm576_vm0, %v4115_v43 }
  0xc3   : > { %3446 = vmatmul.msk.bf16.gmra.mxu0 %vm576_vm0, %v3706_v18  ;;  %v771_v23 = vunpack.c.l.b16 %v716_v20 }
  0xc8   : > { %v641_v21 = vpop.f32.mrf.mxu0 }
  0xc9   : > { %v717_v22 = vpack.c.bf16 %v641_v21, %v641_v21 }
  0xcb   : > { %v772_v24 = vunpack.c.l.b16 %v717_v22 }
  0xcd   : > { %v773_v25 = vpack.c.b16 %v772_v24, %v771_v23 }
  0xcf   : > { %782 = vmatpush.bf16.msrb.mxu2 %v773_v25 }
  0xd0   : > { %v644_v27 = vpop.f32.mrf.mxu0 }
  0xd1   : > { %v718_v28 = vpack.c.bf16 %v644_v27, %v644_v27 }
  0xd2   : > { %3454 = vmatmul.msk.bf16.vlgmr.msrb.gmra.mxu2 %vm576_vm0, %v4115_v43 }
  0xd3   : > { %3447 = vmatmul.msk.bf16.gmra.mxu0 %vm576_vm0, %v3707_v26  ;;  %v790_v31 = vunpack.c.l.b16 %v718_v28 }
  0xd8   : > { %v646_v29 = vpop.f32.mrf.mxu0 }
  0xd9   : > { %v719_v30 = vpack.c.bf16 %v646_v29, %v646_v29 }
  0xdb   : > { %v791_v32 = vunpack.c.l.b16 %v719_v30 }
  0xdd   : > { %v792_v33 = vpack.c.b16 %v791_v32, %v790_v31 }
  0xdf   : > { %801 = vmatpush.bf16.msrb.mxu3 %v792_v33 }
  0xe0   : > { %v649_v36 = vpop.f32.mrf.mxu0 }
  0xe1   : > { %v720_v37 = vpack.c.bf16 %v649_v36, %v649_v36 }
  0xe2   : > { %3455 = vmatmul.msk.bf16.vlgmr.msrb.gmra.mxu3 %vm576_vm0, %v4115_v43 }
  0xe3   : > { %3448 = vmatmul.msk.bf16.gmra.mxu0 %vm576_vm0, %v3708_v35  ;;  %v809_v40 = vunpack.c.l.b16 %v720_v37 }
  0xe8   : > { %v651_v38 = vpop.f32.mrf.mxu0 }
  0xe9   : > { %v721_v39 = vpack.c.bf16 %v651_v38, %v651_v38 }
  0xeb   : > { %v810_v41 = vunpack.c.l.b16 %v721_v39 }
  0xed   : > { %v811_v42 = vpack.c.b16 %v810_v41, %v809_v40  ;;  %v709_v40 = vpop.f32.mrf.mxu2 }
  0xee   : > { %v744_v41 = vpack.c.bf16 %v709_v40, %v709_v40 }
  0xef   : > { %820 = vmatpush.bf16.msra.mxu1 %v811_v42 }
  0xf0   : > { %v654_v45 = vpop.f32.mrf.mxu0 }
  0xf1   : > { %v722_v46 = vpack.c.bf16 %v654_v45, %v654_v45 }
  0xf2   : > { %3456 = vmatmul.msk.bf16.vlgmr.msra.gmra.mxu1 %vm576_vm0, %v4115_v43 }
  0xf3   : > { %3449 = vmatmul.msk.bf16.gmra.mxu0 %vm576_vm0, %v3709_v44  ;;  %v828_v49 = vunpack.c.l.b16 %v722_v46 }
  0xf5   : > { %v711_v45 = vpop.f32.mrf.mxu2 }
  0xf8   : > { %v656_v47 = vpop.f32.mrf.mxu0 }
  0xf9   : > { %v723_v48 = vpack.c.bf16 %v656_v47, %v656_v47  ;;  %v1037_v47 = vunpack.c.l.b16 %v744_v41 }
  0xfb   : > { %v829_v50 = vunpack.c.l.b16 %v723_v48  ;;  %v745_v48 = vpack.c.bf16 %v711_v45, %v711_v45 }
  0xfd   : > { %v830_v51 = vpack.c.b16 %v829_v50, %v828_v49 }
  0xff   : > { %839 = vmatpush.bf16.msra.mxu2 %v830_v51  ;;  %v1038_v51 = vunpack.c.l.b16 %v745_v48 }
 0x100   : > { %v659_v53 = vpop.f32.mrf.mxu0 }
 0x101   : > { %v724_v54 = vpack.c.bf16 %v659_v53, %v659_v53  ;;  %v1039_v53 = vpack.c.b16 %v1038_v51, %v1037_v47  ;;  %v3917_v47 = vmov 1934713408  }
 0x102   : > { %3457 = vmatmul.msk.bf16.vlgmr.msra.gmra.mxu2 %vm576_vm0, %v4115_v43  ;;  %v1108_v48 = vunpack.c.l.s4 %v3917_v47 }
 0x103   : > { %3450 = vmatmul.msk.bf16.gmra.mxu0 %vm576_vm0, %v3710_v52  ;;  %v847_v57 = vunpack.c.l.b16 %v724_v54 }
 0x108   : > { %v661_v55 = vpop.f32.mrf.mxu0 }
 0x109   : > { %v725_v56 = vpack.c.bf16 %v661_v55, %v661_v55 }
 0x10b   : > { %v848_v58 = vunpack.c.l.b16 %v725_v56 }
 0x10d   : > { %v849_v59 = vpack.c.b16 %v848_v58, %v847_v57 }
 0x10f   : > { %858 = vmatpush.bf16.msra.mxu3 %v849_v59 }
 0x110   : > { %v664_v61 = vpop.f32.mrf.mxu0 }
 0x111   : > { %v726_v62 = vpack.c.bf16 %v664_v61, %v664_v61 }
 0x112   : > { %3458 = vmatmul.msk.bf16.vlgmr.msra.gmra.mxu3 %vm576_vm0, %v4115_v43 }
 0x113   : > { %3451 = vmatmul.msk.bf16.gmra.mxu0 %vm576_vm0, %v3711_v60  ;;  %v866_v1 = vunpack.c.l.b16 %v726_v62 }
 0x118   : > { %v666_v63 = vpop.f32.mrf.mxu0 }
 0x119   : > { %v727_v0 = vpack.c.bf16 %v666_v63, %v666_v63 }
 0x11b   : > { %v867_v2 = vunpack.c.l.b16 %v727_v0  ;;  %v3916_v0 = vmov 1983009808  }
 0x11d   : > { %v868_v3 = vpack.c.b16 %v867_v2, %v866_v1  ;;  %v1060_v1 = vunpack.c.l.s4 %v3916_v0 }
 0x11f   : > { %877 = vmatpush.bf16.msrb.mxu1 %v868_v3 }
 0x120   : > { %v669_v4 = vpop.f32.mrf.mxu0 }
 0x121   : > { %v728_v5 = vpack.c.bf16 %v669_v4, %v669_v4 }
 0x122   : > { %3459 = vmatmul.msk.bf16.vlgmr.msrb.gmra.mxu1 %vm576_vm0, %v4115_v43 }
 0x123   : > { %v885_v8 = vunpack.c.l.b16 %v728_v5 }
 0x128   : > { %v671_v6 = vpop.f32.mrf.mxu0 }
 0x129   : > { %v729_v7 = vpack.c.bf16 %v671_v6, %v671_v6 }
 0x12b   : > { %v886_v9 = vunpack.c.l.b16 %v729_v7 }
 0x12d   : > { %v887_v10 = vpack.c.b16 %v886_v9, %v885_v8  ;;  %v4151_v8 = vunpack.c.0.s8 %v1060_v1 }
 0x12f   : > { %896 = vmatpush.bf16.msrb.mxu2 %v887_v10 }
 0x130   : > { %v674_v11 = vpop.f32.mrf.mxu0 }
 0x131   : > { %v730_v12 = vpack.c.bf16 %v674_v11, %v674_v11 }
 0x132   : > { %3460 = vmatmul.msk.bf16.vlgmr.msrb.gmra.mxu2 %vm576_vm0, %v4115_v43 }
 0x133   : > { %v904_v15 = vunpack.c.l.b16 %v730_v12 }
 0x138   : > { %v676_v13 = vpop.f32.mrf.mxu0 }
 0x139   : > { %v731_v14 = vpack.c.bf16 %v676_v13, %v676_v13 }
 0x13b   : > { %v905_v16 = vunpack.c.l.b16 %v731_v14 }
 0x13d   : > { %v906_v17 = vpack.c.b16 %v905_v16, %v904_v15 }
 0x13f   : > { %915 = vmatpush.bf16.msrb.mxu3 %v906_v17 }
 0x140   : > { %v679_v18 = vpop.f32.mrf.mxu0 }
 0x141   : > { %v732_v19 = vpack.c.bf16 %v679_v18, %v679_v18 }
 0x142   : > { %3461 = vmatmul.msk.bf16.vlgmr.msrb.gmra.mxu3 %vm576_vm0, %v4115_v43 }
 0x143   : > { %v923_v22 = vunpack.c.l.b16 %v732_v19 }
 0x145   : > { %v765_v56 = vpop.f32.mrf.mxu3 }
 0x146   : > { %v1057_v11 = vrot.slane %v765_v56, 4 }
 0x148   : > { %v681_v20 = vpop.f32.mrf.mxu0 }
 0x149   : > { %v733_v21 = vpack.c.bf16 %v681_v20, %v681_v20 }
 0x14b   : > { %v924_v23 = vunpack.c.l.b16 %v733_v21 }
 0x14d   : > { %v925_v24 = vpack.c.b16 %v924_v23, %v923_v22  ;;  %v767_v4 = vpop.f32.mrf.mxu3 }
 0x14f   : > { %934 = vmatpush.bf16.msra.mxu1 %v925_v24 }
 0x150   : > { %v684_v25 = vpop.f32.mrf.mxu0 }
 0x151   : > { %v734_v26 = vpack.c.bf16 %v684_v25, %v684_v25 }
 0x152   : > { %3462 = vmatmul.msk.bf16.vlgmr.msra.gmra.mxu1 %vm576_vm0, %v4115_v43 }
 0x153   : > { %v942_v29 = vunpack.c.l.b16 %v734_v26 }
 0x155   : > { %v784_v55 = vpop.f32.mrf.mxu2 }
 0x156   : > { %v1069_v57 = vrot.slane %v784_v55, 4 }
 0x158   : > { %v686_v27 = vpop.f32.mrf.mxu0 }
 0x159   : > { %v735_v28 = vpack.c.bf16 %v686_v27, %v686_v27 }
 0x15b   : > { %v943_v30 = vunpack.c.l.b16 %v735_v28 }
 0x15d   : > { %v944_v31 = vpack.c.b16 %v943_v30, %v942_v29  ;;  %v786_v3 = vpop.f32.mrf.mxu2 }
 0x15f   : > { %953 = vmatpush.bf16.msra.mxu2 %v944_v31 }
 0x160   : > { %v689_v32 = vpop.f32.mrf.mxu0 }
 0x161   : > { %v736_v33 = vpack.c.bf16 %v689_v32, %v689_v32 }
 0x162   : > { %3463 = vmatmul.msk.bf16.vlgmr.msra.gmra.mxu2 %vm576_vm0, %v4115_v43 }
 0x163   : > { %v961_v36 = vunpack.c.l.b16 %v736_v33 }
 0x165   : > { %v803_v15 = vpop.f32.mrf.mxu3 }
 0x166   : > { %v1054_v17 = vrot.slane %v803_v15, 4  ;;  %v1058_v18 = vsel %vm1055_vm1, %v803_v15, %v1057_v11 }
 0x167   : > { %v1066_v19 = vperm.slane %v1058_v18, %v4151_v8 }
 0x168   : > { %v691_v34 = vpop.f32.mrf.mxu0  ;;  %v1056_v21 = vsel %vm1055_vm1, %v1054_v17, %v765_v56 }
 0x169   : > { %v737_v35 = vpack.c.bf16 %v691_v34, %v691_v34  ;;  %v1062_v22 = vperm.slane %v1056_v21, %v4151_v8  ;;  %v1117_v23 = vrot.slane %v1066_v19, 4 }
 0x16b   : > { %v962_v37 = vunpack.c.l.b16 %v737_v35  ;;  %v1105_v27 = vrot.slane %v1062_v22, 4 }
 0x16d   : > { %v963_v38 = vpack.c.b16 %v962_v37, %v961_v36  ;;  %v805_v33 = vpop.f32.mrf.mxu3 }
 0x16f   : > { %972 = vmatpush.bf16.msra.mxu3 %v963_v38  ;;  %v822_v58 = vpop.f32.mrf.mxu1 }
 0x170   : > { %v694_v39 = vpop.f32.mrf.mxu0  ;;  %v1067_v59 = vrot.slane %v822_v58, 4  ;;  %v1070_v60 = vsel %vm1055_vm1, %v822_v58, %v1069_v57 }
 0x171   : > { %v738_v42 = vpack.c.bf16 %v694_v39, %v694_v39  ;;  %v1078_v10 = vperm.slane %v1070_v60, %v4151_v8 }
 0x172   : > { %3464 = vmatmul.msk.bf16.vlgmr.msra.gmra.mxu3 %vm576_vm0, %v4115_v43  ;;  %v1068_v61 = vsel %vm1055_vm1, %v1067_v59, %v784_v55 }
 0x173   : > { %v980_v49 = vunpack.c.l.b16 %v738_v42  ;;  %v1074_v13 = vperm.slane %v1068_v61, %v4151_v8  ;;  %v1115_v16 = vrot.slane %v1078_v10, 4  ;;  %v1118_v29 = vsel %vm1055_vm1, %v1078_v10, %v1117_v23 }
 0x175   : > { %v1103_v20 = vrot.slane %v1074_v13, 4  ;;  %v1116_v24 = vsel %vm1055_vm1, %v1115_v16, %v1066_v19  ;;  %v1106_v31 = vsel %vm1055_vm1, %v1074_v13, %v1105_v27 }
 0x177   : > { %v824_v7 = vpop.f32.mrf.mxu1  ;;  %v1104_v28 = vsel %vm1055_vm1, %v1103_v20, %v1062_v22 }
 0x178   : > { %v696_v44 = vpop.f32.mrf.mxu0 }
 0x179   : > { %v739_v46 = vpack.c.bf16 %v696_v44, %v696_v44 }
 0x17b   : > { %v981_v50 = vunpack.c.l.b16 %v739_v46 }
 0x17d   : > { %v982_v52 = vpack.c.b16 %v981_v50, %v980_v49 }
 0x17f   : > { %991 = vmatpush.bf16.msrb.mxu1 %v982_v52 }
 0x180   : > { %v699_v54 = vpop.f32.mrf.mxu0 }
 0x181   : > { %v740_v62 = vpack.c.bf16 %v699_v54, %v699_v54 }
 0x182   : > { %3465 = vmatmul.msk.bf16.vlgmr.msrb.gmra.mxu1 %vm576_vm0, %v4115_v43 }
 0x183   : > { %1048 = vmatpush.bf16.msra.mxu1 %v1039_v53  ;;  %v999_v5 = vunpack.c.l.b16 %v740_v62  ;;  %v4173_v53 = vunpack.c.0.s8 %v1108_v48 }
 0x185   : > { %v841_v14 = vpop.f32.mrf.mxu2  ;;  %v1110_v57 = vperm.slane %v1104_v28, %v4173_v53  ;;  %v1122_v59 = vperm.slane %v1116_v24, %v4173_v53  ;;  %v1126_v0 = vperm.slane %v1118_v29, %v4173_v53 }
 0x186   : > { %v1081_v36 = vrot.slane %v841_v14, 4 }
 0x187   : > { %v1165_v16 = vrot.slane %v1126_v0, 4 }
 0x188   : > { %v701_v63 = vpop.f32.mrf.mxu0 }
 0x189   : > { %v741_v2 = vpack.c.bf16 %v701_v63, %v701_v63  ;;  %v1114_v63 = vperm.slane %v1106_v31, %v4173_v53 }
 0x18b   : > { %v1000_v6 = vunpack.c.l.b16 %v741_v2 }
 0x18d   : > { %v1001_v9 = vpack.c.b16 %v1000_v6, %v999_v5  ;;  %v843_v32 = vpop.f32.mrf.mxu2  ;;  %v1153_v6 = vrot.slane %v1110_v57, 4 }
 0x18f   : > { %1010 = vmatpush.bf16.msrb.mxu2 %v1001_v9  ;;  %v1161_v9 = vrot.slane %v1122_v59, 4 }
 0x190   : > { %v704_v12 = vpop.f32.mrf.mxu0 }
 0x191   : > { %v742_v25 = vpack.c.bf16 %v704_v12, %v704_v12 }
 0x192   : > { %3466 = vmatmul.msk.bf16.vlgmr.msrb.gmra.mxu2 %vm576_vm0, %v4115_v43  ;;  %3468 = vmatmul.msk.bf16.vlgmr.msra.gmra.mxu1 %vm576_vm0, %v4115_v43 }
 0x193   : > { %v1018_v34 = vunpack.c.l.b16 %v742_v25 }
 0x195   : > { %v860_v41 = vpop.f32.mrf.mxu3 }
 0x196   : > { %v1093_v49 = vrot.slane %v860_v41, 4 }
 0x198   : > { %v706_v26 = vpop.f32.mrf.mxu0 }
 0x199   : > { %v743_v30 = vpack.c.bf16 %v706_v26, %v706_v26 }
 0x19b   : > { %v1019_v35 = vunpack.c.l.b16 %v743_v30 }
 0x19d   : > { %v1020_v37 = vpack.c.b16 %v1019_v35, %v1018_v34  ;;  %v862_v45 = vpop.f32.mrf.mxu3 }
 0x19f   : > { %1029 = vmatpush.bf16.msrb.mxu3 %v1020_v37  ;;  %v879_v38 = vpop.f32.mrf.mxu1 }
 0x1a0   : > { %v1079_v39 = vrot.slane %v879_v38, 4  ;;  %v1082_v40 = vsel %vm1055_vm1, %v879_v38, %v1081_v36 }
 0x1a1   : > { %v1090_v46 = vperm.slane %v1082_v40, %v4151_v8 }
 0x1a2   : > { %3467 = vmatmul.msk.bf16.vlgmr.msrb.gmra.mxu3 %vm576_vm0, %v4115_v43  ;;  %v1080_v42 = vsel %vm1055_vm1, %v1079_v39, %v841_v14  ;;  %v1157_v14 = vrot.slane %v1114_v63, 4 }
 0x1a3   : > { %v1086_v50 = vperm.slane %v1080_v42, %v4151_v8  ;;  %v1141_v52 = vrot.slane %v1090_v46, 4 }
 0x1a5   : > { %v1129_v56 = vrot.slane %v1086_v50, 4 }
 0x1a7   : > { %v881_v44 = vpop.f32.mrf.mxu1 }
 0x1b5   : > { %v898_v51 = vpop.f32.mrf.mxu2 }
 0x1b6   : > { %v1091_v54 = vrot.slane %v898_v51, 4  ;;  %v1094_v55 = vsel %vm1055_vm1, %v898_v51, %v1093_v49 }
 0x1b7   : > { %v1102_v43 = vperm.slane %v1094_v55, %v4151_v8 }
 0x1b8   : > { %v1092_v58 = vsel %vm1055_vm1, %v1091_v54, %v860_v41 }
 0x1b9   : > { %v1098_v60 = vperm.slane %v1092_v58, %v4151_v8  ;;  %v1139_v61 = vrot.slane %v1102_v43, 4  ;;  %v1142_v62 = vsel %vm1055_vm1, %v1102_v43, %v1141_v52 }
 0x1ba   : > { %v1150_v4 = vperm.slane %v1142_v62, %v4173_v53 }
 0x1bb   : > { %v1127_v1 = vrot.slane %v1098_v60, 4  ;;  %v1130_v2 = vsel %vm1055_vm1, %v1098_v60, %v1129_v56  ;;  %v1140_v3 = vsel %vm1055_vm1, %v1139_v61, %v1090_v46 }
 0x1bc   : > { %v1146_v5 = vperm.slane %v1140_v3, %v4173_v53  ;;  %v1138_v7 = vperm.slane %v1130_v2, %v4173_v53  ;;  %v1163_v17 = vrot.slane %v1150_v4, 4  ;;  %v4208_v25 = vsel %vm1055_vm1, %v1150_v4, %v1165_v16 }
 0x1bd   : > { %v1128_v10 = vsel %vm1055_vm1, %v1127_v1, %v1086_v50  ;;  %v900_v11 = vpop.f32.mrf.mxu2 }
 0x1be   : > { %v1134_v12 = vperm.slane %v1128_v10, %v4173_v53  ;;  %v1159_v13 = vrot.slane %v1146_v5, 4  ;;  %v1155_v15 = vrot.slane %v1138_v7, 4  ;;  %v4196_v21 = vsel %vm1055_vm1, %v1138_v7, %v1157_v14 }
 0x1bf   : > { %v4205_v24 = vsel %vm1055_vm1, %v1146_v5, %v1161_v9  ;;  %v4211_v26 = vsel %vm1055_vm1, %v1163_v17, %v1126_v0 }
 0x1c0   : > { %v1154_v18 = vsel %vm1055_vm1, %v1134_v12, %v1153_v6  ;;  %v4193_v19 = vsel %vm1055_vm1, %v1159_v13, %v1122_v59  ;;  %v1151_v20 = vrot.slane %v1134_v12, 4  ;;  %v4199_v22 = vsel %vm1055_vm1, %v1155_v15, %v1114_v63 }
 0x1c1   : > { %v1281_v3 = vpack.c.bf16 %v1154_v18, %v1154_v18  ;;  %v1287_v5 = vpack.c.bf16 %v4193_v19, %v4193_v19  ;;  %v1289_v9 = vpack.c.bf16 %v4205_v24, %v4205_v24  ;;  %v1285_v13 = vpack.c.bf16 %v4196_v21, %v4196_v21 }
 0x1c2   : > { %v4202_v23 = vsel %vm1055_vm1, %v1151_v20, %v1110_v57  ;;  %v1283_v14 = vpack.c.bf16 %v4199_v22, %v4199_v22  ;;  %v1293_v18 = vpack.c.bf16 %v4208_v25, %v4208_v25 }
 0x1c3   : > { %v1279_v7 = vpack.c.bf16 %v4202_v23, %v4202_v23  ;;  %v4235_v12 = vunpack.c.l.b16 %v1281_v3  ;;  %v1377_v24 = vunpack.c.l.b16 %v1287_v5 }
 0x1c5   : > { %v917_v27 = vpop.f32.mrf.mxu3 }
 0x1c6   : > { %v1169_v31 = vrot.slane %v917_v27, 4 }
 0x1cd   : > { %v919_v28 = vpop.f32.mrf.mxu3 }
 0x1ce   : > { %v1298_v28 = vunpack.c.l.b16 %v1279_v7 }
 0x1cf   : > { %v936_v29 = vpop.f32.mrf.mxu1 }
 0x1d0   : > { %v1181_v38 = vrot.slane %v936_v29, 4 }
 0x1d7   : > { %v938_v30 = vpop.f32.mrf.mxu1 }
 0x1e5   : > { %v955_v32 = vpop.f32.mrf.mxu2 }
 0x1e6   : > { %v1170_v33 = vsel %vm1055_vm1, %v955_v32, %v1169_v31  ;;  %v1167_v34 = vrot.slane %v955_v32, 4 }
 0x1e7   : > { %v1178_v37 = vperm.slane %v1170_v33, %v4151_v8 }
 0x1e8   : > { %v1168_v36 = vsel %vm1055_vm1, %v1167_v34, %v917_v27 }
 0x1e9   : > { %v1174_v39 = vperm.slane %v1168_v36, %v4151_v8  ;;  %v1229_v41 = vrot.slane %v1178_v37, 4  ;;  %v1291_v36 = vpack.c.bf16 %v4211_v26, %v4211_v26 }
 0x1eb   : > { %v1217_v46 = vrot.slane %v1174_v39, 4 }
 0x1ed   : > { %v957_v35 = vpop.f32.mrf.mxu2 }
 0x1ee   : > { %v1434_v35 = vunpack.c.l.b16 %v1293_v18 }
 0x1f5   : > { %v974_v40 = vpop.f32.mrf.mxu3 }
 0x1f6   : > { %v1179_v42 = vrot.slane %v974_v40, 4  ;;  %v1182_v44 = vsel %vm1055_vm1, %v974_v40, %v1181_v38 }
 0x1f7   : > { %v1190_v45 = vperm.slane %v1182_v44, %v4151_v8 }
 0x1f8   : > { %v1180_v47 = vsel %vm1055_vm1, %v1179_v42, %v936_v29  ;;  %v4249_v29 = vunpack.c.l.b16 %v1289_v9 }
 0x1f9   : > { %v1186_v48 = vperm.slane %v1180_v47, %v4151_v8  ;;  %v1227_v49 = vrot.slane %v1190_v45, 4  ;;  %v1230_v50 = vsel %vm1055_vm1, %v1190_v45, %v1229_v41 }
 0x1fa   : > { %v1238_v27 = vperm.slane %v1230_v50, %v4173_v53 }
 0x1fb   : > { %v1215_v51 = vrot.slane %v1186_v48, 4  ;;  %v1218_v52 = vsel %vm1055_vm1, %v1186_v48, %v1217_v46  ;;  %v1228_v54 = vsel %vm1055_vm1, %v1227_v49, %v1178_v37 }
 0x1fc   : > { %v1234_v15 = vperm.slane %v1228_v54, %v4173_v53  ;;  %v1226_v30 = vperm.slane %v1218_v52, %v4173_v53  ;;  %v1277_v46 = vrot.slane %v1238_v27, 4 }
 0x1fd   : > { %v1216_v55 = vsel %vm1055_vm1, %v1215_v51, %v1174_v39  ;;  %v976_v43 = vpop.f32.mrf.mxu3 }
 0x1fe   : > { %v1222_v19 = vperm.slane %v1216_v55, %v4173_v53  ;;  %v1273_v33 = vrot.slane %v1234_v15, 4  ;;  %v1269_v49 = vrot.slane %v1226_v30, 4 }
 0x1ff   : > { %v993_v56 = vpop.f32.mrf.mxu1 }
 0x200   : > { %v1193_v6 = vrot.slane %v993_v56, 4  ;;  %v1265_v40 = vrot.slane %v1222_v19, 4 }
 0x207   : > { %v995_v57 = vpop.f32.mrf.mxu1 }
 0x20f   : > { %v1050_v58 = vpop.f32.mrf.mxu1 }
 0x210   : > { %v1203_v62 = vrot.slane %v1050_v58, 4 }
 0x215   : > { %v1012_v59 = vpop.f32.mrf.mxu2 }
 0x216   : > { %v1205_v61 = vrot.slane %v1012_v59, 4  ;;  %v1204_v1 = vsel %vm1055_vm1, %v1203_v62, %v1012_v59 }
 0x217   : > { %v1052_v60 = vpop.f32.mrf.mxu1  ;;  %v1210_v4 = vperm.slane %v1204_v1, %v4151_v8 }
 0x218   : > { %v1206_v0 = vsel %vm1055_vm1, %v1050_v58, %v1205_v61 }
 0x219   : > { %v1214_v2 = vperm.slane %v1206_v0, %v4151_v8  ;;  %v1239_v20 = vrot.slane %v1210_v4, 4 }
 0x21b   : > { %v1251_v10 = vrot.slane %v1214_v2, 4 }
 0x21d   : > { %v1014_v63 = vpop.f32.mrf.mxu2 }
 0x225   : > { %v1031_v11 = vpop.f32.mrf.mxu3 }
 0x226   : > { %v1191_v16 = vrot.slane %v1031_v11, 4  ;;  %v1194_v17 = vsel %vm1055_vm1, %v1031_v11, %v1193_v6  ;;  %v1358_v11 = vunpack.c.l.b16 %v1285_v13 }
 0x227   : > { %v1202_v23 = vperm.slane %v1194_v17, %v4151_v8 }
 0x228   : > { %v1192_v21 = vsel %vm1055_vm1, %v1191_v16, %v993_v56 }
 0x229   : > { %v1198_v31 = vperm.slane %v1192_v21, %v4151_v8  ;;  %v1252_v32 = vsel %vm1055_vm1, %v1251_v10, %v1202_v23  ;;  %v1253_v25 = vrot.slane %v1202_v23, 4  ;;  %v1415_v23 = vunpack.c.l.b16 %v1291_v36  ;;  %v3719_v36 = vld [vmem:[%s4294_s12 + $0x28] sm:$0xff] }
 0x22a   : > { %v1258_v34 = vperm.slane %v1252_v32, %v4173_v53  ;;  %v3918_v32 = vmov 0  }
 0x22b   : > { %v1240_v37 = vsel %vm1055_vm1, %v1239_v20, %v1198_v31  ;;  %v1241_v38 = vrot.slane %v1198_v31, 4  ;;  %v1254_v39 = vsel %vm1055_vm1, %v1214_v2, %v1253_v25  ;;  %v3716_v31 = vld [vmem:[%s4294_s12 + $0x10] sm:$0xff]  ;;  %431 = vst.msk [vmem:[#allocation2] sm:$0xf] %vm430_vm4, %v3918_v32  ;;  %3814 = vset.pattern.permute.xlu1 %v3918_v32  ;;  %3815 = vset.pattern.permute.xlu0 %v3918_v32  ;;  %v3717_v25 = vld [vmem:[%s4294_s12 + $0x18] sm:$0xff] }
 0x22c   : > { %v1246_v41 = vperm.slane %v1240_v37, %v4173_v53  ;;  %v1262_v42 = vperm.slane %v1254_v39, %v4173_v53  ;;  %v1271_v44 = vrot.slane %v1258_v34, 4  ;;  %v1274_v45 = vsel %vm1055_vm1, %v1258_v34, %v1273_v33  ;;  %435 = vst.msk [vmem:[#allocation2] sm:$0xf] %vm434_vm5, %v3918_v32  ;;  %v3720_v37 = vld [vmem:[%s4294_s12 + $0x30] sm:$0xff] }
 0x22d   : > { %v1242_v47 = vsel %vm1055_vm1, %v1210_v4, %v1241_v38  ;;  %v1033_v48 = vpop.f32.mrf.mxu3  ;;  %v1290_v50 = vpack.c.bf16 %v1274_v45, %v1274_v45  ;;  %446 = vst.msk [vmem:[#allocation2] sm:$0xf] %vm445_vm6, %v3918_v32 }
 0x22e   : > { %v1275_v26 = vrot.slane %v1262_v42, 4  ;;  %v1266_v51 = vsel %vm1055_vm1, %v1246_v41, %v1265_v40  ;;  %v1272_v52 = vsel %vm1055_vm1, %v1271_v44, %v1234_v15  ;;  %v1263_v54 = vrot.slane %v1246_v41, 4  ;;  %433 = vst.msk [vmem:[#allocation2 + $0x24] sm:$0xf] %vm430_vm4, %v3918_v32  ;;  %v3721_v41 = vld [vmem:[%s4294_s12 + $0x38] sm:$0xff] }
 0x22f   : > { %v1282_v55 = vpack.c.bf16 %v1266_v51, %v1266_v51  ;;  %v1288_v43 = vpack.c.bf16 %v1272_v52, %v1272_v52  ;;  %v1250_v56 = vperm.slane %v1242_v47, %v4173_v53  ;;  %v1278_v57 = vsel %vm1055_vm1, %v1262_v42, %v1277_v46  ;;  %436 = vst.msk [vmem:[#allocation2 + $0x4] sm:$0xf] %vm434_vm5, %v3918_v32 }
 0x230   : > { %v1264_v58 = vsel %vm1055_vm1, %v1263_v54, %v1222_v19  ;;  %v1294_v59 = vpack.c.bf16 %v1278_v57, %v1278_v57  ;;  %v1397_v60 = vunpack.c.l.b16 %v1290_v50  ;;  %v1276_v61 = vsel %vm1055_vm1, %v1275_v26, %v1238_v27  ;;  %v1295_v19 = vld [vmem:[%s4756_s2] sm:$0x3]  ;;  %437 = vst.msk [vmem:[#allocation2 + $0x8] sm:$0xf] %vm434_vm5, %v3918_v32 }
 0x231   : > { %v1321_v62 = vunpack.c.l.b16 %v1282_v55  ;;  %v1378_v63 = vunpack.c.l.b16 %v1288_v43  ;;  %v1280_v0 = vpack.c.bf16 %v1264_v58, %v1264_v58  ;;  %v1270_v1 = vsel %vm1055_vm1, %v1250_v56, %v1269_v49  ;;  %438 = vst.msk [vmem:[#allocation2 + $0xc] sm:$0xf] %vm434_vm5, %v3918_v32  ;;  %v4342_v49 = vld [vmem:[%s4758_s4] sm:$0xf] }
 0x232   : > { %v1286_v2 = vpack.c.bf16 %v1270_v1, %v1270_v1  ;;  %v1267_v3 = vrot.slane %v1250_v56, 4  ;;  %v1435_v4 = vunpack.c.l.b16 %v1294_v59  ;;  %v1398_v5 = vpack.c.b16 %v1397_v60, %v4249_v29  ;;  %v1517_v29 = vld [vmem:[%s4760_s6] sm:$0xf]  ;;  %439 = vst.msk [vmem:[#allocation2 + $0x10] sm:$0xf] %vm434_vm5, %v3918_v32 }
 0x233   : > { %v1322_v6 = vpack.c.b16 %v1321_v62, %v4235_v12  ;;  %v1379_v7 = vpack.c.b16 %v1378_v63, %v1377_v24  ;;  %v1299_v9 = vunpack.c.l.b16 %v1280_v0  ;;  %v1292_v10 = vpack.c.bf16 %v1276_v61, %v1276_v61  ;;  %440 = vst.msk [vmem:[#allocation2 + $0x14] sm:$0xf] %vm434_vm5, %v3918_v32 }
 0x234   : > { %v1359_v15 = vunpack.c.l.b16 %v1286_v2  ;;  %v1268_v16 = vsel %vm1055_vm1, %v1267_v3, %v1226_v30  ;;  %v1436_v17 = vpack.c.b16 %v1435_v4, %v1434_v35  ;;  %v1339_v12 = vunpack.c.l.b16 %v1283_v14  ;;  %v3714_v14 = vld [vmem:[%s4294_s12] sm:$0xff]  ;;  %v3715_v30 = vld [vmem:[%s4294_s12 + $0x8] sm:$0xff]  ;;  %441 = vst.msk [vmem:[#allocation2 + $0x18] sm:$0xf] %vm434_vm5, %v3918_v32 }
 0x235   : > { %1331 = vmatpush.bf16.msra.mxu3 %v1322_v6  ;;  %v1300_v18 = vpack.c.b16 %v1299_v9, %v1298_v28  ;;  %v1284_v20 = vpack.c.bf16 %v1268_v16, %v1268_v16  ;;  %v1416_v27 = vunpack.c.l.b16 %v1292_v10  ;;  %v1585_v22 = vsel %vm1583_vm2, %v1517_v29, 0  ;;  %v2431_v33 = vld [vmem:[#allocation2] sm:$0xf]  ;;  %442 = vst.msk [vmem:[#allocation2 + $0x1c] sm:$0xf] %vm434_vm5, %v3918_v32 }
 0x236   : > { %v1360_v21 = vpack.c.b16 %v1359_v15, %v1358_v11  ;;  %2447 = vrot.lane.b32.xlu2 %v2431_v33, %s3919_s14  ;;  %443 = vst.msk [vmem:[#allocation2 + $0x20] sm:$0xf] %vm434_vm5, %v3918_v32  ;;  %v2383_v34 = vld [vmem:[#allocation2] sm:$0xf] }
 0x237   : > { %1312 = vmatpush.bf16.msra.mxu2 %v1300_v18  ;;  %v1340_v13 = vunpack.c.l.b16 %v1284_v20  ;;  %v1417_v24 = vpack.c.b16 %v1416_v27, %v1415_v23  ;;  %444 = vst.msk [vmem:[#allocation2 + $0x24] sm:$0xf] %vm434_vm5, %v3918_v32  ;;  %v3718_v35 = vld [vmem:[%s4294_s12 + $0x20] sm:$0xff]  ;;  %s3866_s12 = scalar_lea.hbm %s4765_s11, 64 }
 0x238   : > { %3470 = vmatmul.msk.bf16.vlgmr.msra.gmra.mxu3 %vm576_vm0, %v1295_v19  ;;  %447 = vst.msk [vmem:[#allocation2 + $0x4] sm:$0xf] %vm445_vm6, %v3918_v32  ;;  %p3868_p3 = scmp.lt.s32.totalorder %s3866_s12, %s3862_s18 }
 0x239   : > { %1388 = vmatpush.bf16.msrb.mxu3 %v1379_v7  ;;  %v1341_v28 = vpack.c.b16 %v1340_v13, %v1339_v12  ;;  %448 = vst.msk [vmem:[#allocation2 + $0x8] sm:$0xf] %vm445_vm6, %v3918_v32 }
 0x23a   : > { %3469 = vmatmul.msk.bf16.vlgmr.msra.gmra.mxu2 %vm576_vm0, %v1295_v19  ;;  %449 = vst.msk [vmem:[#allocation2 + $0xc] sm:$0xf] %vm445_vm6, %v3918_v32  ;;  %p3869_p4 = por %p3868_p3, %p3867_p1 }
 0x23b   : > { %1369 = vmatpush.bf16.msrb.mxu2 %v1360_v21  ;;  %1350 = vmatpush.bf16.msrb.mxu1 %v1341_v28  ;;  %450 = vst.msk [vmem:[#allocation2 + $0x10] sm:$0xf] %vm445_vm6, %v3918_v32 }
 0x23c   : > { %451 = vst.msk [vmem:[#allocation2 + $0x14] sm:$0xf] %vm445_vm6, %v3918_v32  ;;  %p3870_p7 = pnand %p3869_p4, %p3865_p0 }
 0x23d   : > { %1445 = vmatpush.bf16.msra.mxu3 %v1436_v17  ;;  %452 = vst.msk [vmem:[#allocation2 + $0x18] sm:$0xf] %vm445_vm6, %v3918_v32 }
 0x23e   : > { %3471 = vmatmul.msk.bf16.vlgmr.msrb.gmra.mxu1 %vm576_vm0, %v1295_v19  ;;  %2399 = vrot.lane.b32.xlu2 %v2383_v34, %s3920_s21  ;;  %453 = vst.msk [vmem:[#allocation2 + $0x1c] sm:$0xf] %vm445_vm6, %v3918_v32 }
 0x23f   : > { %1426 = vmatpush.bf16.msra.mxu2 %v1417_v24  ;;  %1407 = vmatpush.bf16.msra.mxu1 %v1398_v5  ;;  %454 = vst.msk [vmem:[#allocation2 + $0x20] sm:$0xf] %vm445_vm6, %v3918_v32 }
 0x240   : > { %455 = vst.msk [vmem:[#allocation2 + $0x24] sm:$0xf] %vm445_vm6, %v3918_v32 }
 0x243   : > { %1594 = vmatpush.bf16.msrb.mxu1 %v1585_v22 }
 0x247   : > { %v2615_v11 = vld [vmem:[#allocation2 + $0x24] sm:$0xf] }
 0x248   : > { %3473 = vmatmul.msk.bf16.vlgmr.msrb.gmra.mxu3 %vm576_vm0, %v1295_v19  ;;  %2638 = vrot.lane.b32.xlu0 %v2615_v11, %s3920_s21  ;;  %v2663_v16 = vld [vmem:[#allocation2 + $0x24] sm:$0xf] }
 0x249   : > { %2686 = vrot.lane.b32.xlu1 %v2663_v16, %s3919_s14 }
 0x24a   : > { %3472 = vmatmul.msk.bf16.vlgmr.msrb.gmra.mxu2 %vm576_vm0, %v1295_v19 }
 0x24e   : > { %3474 = vmatmul.msk.bf16.vlgmr.msra.gmra.mxu1 %vm576_vm0, %v1295_v19 }
 0x258   : > { %3476 = vmatmul.msk.bf16.vlgmr.msra.gmra.mxu3 %vm576_vm0, %v1295_v19 }
 0x25a   : > { %3475 = vmatmul.msk.bf16.vlgmr.msra.gmra.mxu2 %vm576_vm0, %v1295_v19 }
 0x25e   : > { %3509 = vmatmul.msk.bf16.vlgmr.msrb.gmra.mxu1 %vm1558_vm3, %v3714_v14 }
 0x26e   : > { %3510 = vmatmul.msk.bf16.gmra.mxu1 %vm1558_vm3, %v3715_v30 }
 0x27e   : > { %3511 = vmatmul.msk.bf16.gmra.mxu1 %vm1558_vm3, %v3716_v31 }
 0x28e   : > { %3512 = vmatmul.msk.bf16.gmra.mxu1 %vm1558_vm3, %v3717_v25 }
 0x290   : > { %v2448_v52 = vpop.permute.xlu2 %2447 }
 0x291   : > { %2471 = vst.msk [vmem:[#allocation3 + $0x8] sm:$0xf] %vm2374_vm7, %v2448_v52 }
 0x298   : > { %v2400_v56 = vpop.permute.xlu2 %2399 }
 0x299   : > { %2423 = vst.msk [vmem:[#allocation3 + $0x4] sm:$0xf] %vm2374_vm7, %v2400_v56 }
 0x29e   : > { %3513 = vmatmul.msk.bf16.gmra.mxu1 %vm1558_vm3, %v3718_v35 }
 0x2ae   : > { %3514 = vmatmul.msk.bf16.gmra.mxu1 %vm1558_vm3, %v3719_v36 }
 0x2bb   : > { %v1352_v38 = vpop.f32.mrf.mxu1  ;;  %v1333_v9 = vpop.f32.mrf.mxu3 }
 0x2bc   : > { %v1453_v39 = vpack.c.bf16 %v1352_v38, %v1352_v38  ;;  %v1452_v19 = vpack.c.bf16 %v1333_v9, %v1333_v9 }
 0x2bd   : > { %v1314_v7 = vpop.f32.mrf.mxu2 }
 0x2be   : > { %3515 = vmatmul.msk.bf16.gmra.mxu1 %vm1558_vm3, %v3720_v37  ;;  %1471 = vrot.lane.b32.xlu2 %v1453_v39, %s3921_s27  ;;  %v1451_v21 = vpack.c.bf16 %v1314_v7, %v1314_v7 }
 0x2bf   : > { %1469 = vrot.lane.b32.xlu0 %v1452_v19, %s3921_s27 }
 0x2c0   : > { %1467 = vrot.lane.b32.xlu1 %v1451_v21, %s3921_s27 }
 0x2c3   : > { %v1354_v40 = vpop.f32.mrf.mxu1  ;;  %v1335_v23 = vpop.f32.mrf.mxu3 }
 0x2c5   : > { %v1316_v20 = vpop.f32.mrf.mxu2 }
 0x2cb   : > { %v1409_v42 = vpop.f32.mrf.mxu1  ;;  %v1390_v28 = vpop.f32.mrf.mxu3 }
 0x2cc   : > { %v1456_v44 = vpack.c.bf16 %v1409_v42, %v1409_v42  ;;  %v1455_v14 = vpack.c.bf16 %v1390_v28, %v1390_v28 }
 0x2cd   : > { %v1371_v24 = vpop.f32.mrf.mxu2 }
 0x2ce   : > { %3516 = vmatmul.msk.bf16.gmra.mxu1 %vm1558_vm3, %v3721_v41  ;;  %1477 = vrot.lane.b32.xlu2 %v1456_v44, %s3921_s27  ;;  %v1454_v22 = vpack.c.bf16 %v1371_v24, %v1371_v24  ;;  %v2687_v24 = vpop.permute.xlu1 %2686 }
 0x2cf   : > { %1475 = vrot.lane.b32.xlu0 %v1455_v14, %s3921_s27  ;;  %2703 = vst.msk [vmem:[#allocation3 + $0x11c] sm:$0xf] %vm2374_vm7, %v2687_v24 }
 0x2d0   : > { %1473 = vrot.lane.b32.xlu1 %v1454_v22, %s3921_s27 }
 0x2d3   : > { %v1411_v45 = vpop.f32.mrf.mxu1  ;;  %v1392_v33 = vpop.f32.mrf.mxu3 }
 0x2d5   : > { %v1373_v25 = vpop.f32.mrf.mxu2 }
 0x2db   : > { %v1596_v46 = vpop.f32.mrf.mxu1  ;;  %v1447_v38 = vpop.f32.mrf.mxu3 }
 0x2dc   : > { %v1636_v47 = vpack.c.bf16 %v1596_v46, %v1596_v46  ;;  %v1458_v41 = vpack.c.bf16 %v1447_v38, %v1447_v38 }
 0x2dd   : > { %v1428_v37 = vpop.f32.mrf.mxu2 }
 0x2de   : > { %v1657_v48 = vsel %vm1583_vm2, %v1636_v47, 0  ;;  %v1457_v40 = vpack.c.bf16 %v1428_v37, %v1428_v37  ;;  %1481 = vrot.lane.b32.xlu2 %v1458_v41, %s3921_s27 }
 0x2df   : > { %1666 = vmatpush.bf16.msrb.mxu2 %v1657_v48 }
 0x2e0   : > { %1479 = vrot.lane.b32.xlu0 %v1457_v40, %s3921_s27 }
 0x2e2   : > { %3517 = vmatmul.msk.bf16.vlgmr.msrb.gmra.mxu2 %vm1558_vm3, %v4342_v49 }
 0x2e3   : > { %v1598_v50 = vpop.f32.mrf.mxu1  ;;  %v1449_v46 = vpop.f32.mrf.mxu3 }
 0x2e4   : > { %v1637_v26 = vpack.c.bf16 %v1598_v50, %v1598_v50 }
 0x2e5   : > { %v1430_v45 = vpop.f32.mrf.mxu2 }
 0x2e6   : > { %v1673_v51 = vsel %vm1583_vm2, %v1637_v26, 0 }
 0x2e7   : > { %1682 = vmatpush.bf16.msrb.mxu3 %v1673_v51 }
 0x2ea   : > { %3518 = vmatmul.msk.bf16.vlgmr.msrb.gmra.mxu3 %vm1558_vm3, %v4342_v49 }
 0x2eb   : > { %v1601_v54 = vpop.f32.mrf.mxu1 }
 0x2ec   : > { %v1638_v55 = vpack.c.bf16 %v1601_v54, %v1601_v54 }
 0x2ee   : > { %v1689_v43 = vsel %vm1583_vm2, %v1638_v55, 0 }
 0x2ef   : > { %1698 = vmatpush.bf16.msra.mxu2 %v1689_v43 }
 0x2f2   : > { %3519 = vmatmul.msk.bf16.vlgmr.msra.gmra.mxu2 %vm1558_vm3, %v4342_v49 }
 0x2f3   : > { %v1603_v57 = vpop.f32.mrf.mxu1 }
 0x2f4   : > { %v1639_v58 = vpack.c.bf16 %v1603_v57, %v1603_v57 }
 0x2f6   : > { %v1705_v59 = vsel %vm1583_vm2, %v1639_v58, 0 }
 0x2f7   : > { %1714 = vmatpush.bf16.msra.mxu3 %v1705_v59 }
 0x2fa   : > { %3520 = vmatmul.msk.bf16.vlgmr.msra.gmra.mxu3 %vm1558_vm3, %v4342_v49 }
 0x2fb   : > { %v1606_v60 = vpop.f32.mrf.mxu1 }
 0x2fc   : > { %v1640_v61 = vpack.c.bf16 %v1606_v60, %v1606_v60 }
 0x2fe   : > { %v1721_v62 = vsel %vm1583_vm2, %v1640_v61, 0 }
 0x2ff   : > { %1730 = vmatpush.bf16.msrb.mxu2 %v1721_v62 }
 0x302   : > { %3521 = vmatmul.msk.bf16.vlgmr.msrb.gmra.mxu2 %vm1558_vm3, %v4342_v49 }
 0x303   : > { %v1608_v63 = vpop.f32.mrf.mxu1 }
 0x304   : > { %v1641_v0 = vpack.c.bf16 %v1608_v63, %v1608_v63 }
 0x306   : > { %v1737_v1 = vsel %vm1583_vm2, %v1641_v0, 0 }
 0x307   : > { %1746 = vmatpush.bf16.msrb.mxu3 %v1737_v1 }
 0x30a   : > { %3522 = vmatmul.msk.bf16.vlgmr.msrb.gmra.mxu3 %vm1558_vm3, %v4342_v49 }
 0x30b   : > { %v1611_v2 = vpop.f32.mrf.mxu1 }
 0x30c   : > { %v1642_v3 = vpack.c.bf16 %v1611_v2, %v1611_v2 }
 0x30e   : > { %v1753_v4 = vsel %vm1583_vm2, %v1642_v3, 0 }
 0x30f   : > { %1762 = vmatpush.bf16.msra.mxu2 %v1753_v4 }
 0x312   : > { %3523 = vmatmul.msk.bf16.vlgmr.msra.gmra.mxu2 %vm1558_vm3, %v4342_v49 }
 0x313   : > { %v1613_v5 = vpop.f32.mrf.mxu1 }
 0x314   : > { %v1643_v6 = vpack.c.bf16 %v1613_v5, %v1613_v5 }
 0x316   : > { %v1769_v10 = vsel %vm1583_vm2, %v1643_v6, 0 }
 0x317   : > { %1778 = vmatpush.bf16.msra.mxu3 %v1769_v10 }
 0x318   : > { %v1472_v15 = vpop.permute.xlu2 %1471 }
 0x319   : > { %1495 = vst.msk [vmem:[#allocation2 + $0xc] sm:$0x3] %vm1492_vm8, %v1472_v15 }
 0x31a   : > { %3524 = vmatmul.msk.bf16.vlgmr.msra.gmra.mxu3 %vm1558_vm3, %v4342_v49 }
 0x31b   : > { %v1616_v17 = vpop.f32.mrf.mxu1 }
 0x31c   : > { %v1644_v18 = vpack.c.bf16 %v1616_v17, %v1616_v17 }
 0x31e   : > { %v1785_v27 = vsel %vm1583_vm2, %v1644_v18, 0 }
 0x31f   : > { %1794 = vmatpush.bf16.msrb.mxu2 %v1785_v27 }
 0x322   : > { %3525 = vmatmul.msk.bf16.vlgmr.msrb.gmra.mxu2 %vm1558_vm3, %v4342_v49 }
 0x323   : > { %v1618_v12 = vpop.f32.mrf.mxu1 }
 0x324   : > { %v1645_v13 = vpack.c.bf16 %v1618_v12, %v1618_v12 }
 0x326   : > { %v1801_v29 = vsel %vm1583_vm2, %v1645_v13, 0  ;;  %v2639_v13 = vpop.permute.xlu0 %2638 }
 0x327   : > { %1810 = vmatpush.bf16.msrb.mxu3 %v1801_v29  ;;  %2655 = vst.msk [vmem:[#allocation3 + $0x118] sm:$0xf] %vm2374_vm7, %v2639_v13 }
 0x328   : > { %v1478_v30 = vpop.permute.xlu2 %1477 }
 0x329   : > { %1498 = vst.msk [vmem:[#allocation2 + $0x18] sm:$0x3] %vm1492_vm8, %v1478_v30 }
 0x32a   : > { %3526 = vmatmul.msk.bf16.vlgmr.msrb.gmra.mxu3 %vm1558_vm3, %v4342_v49 }
 0x32b   : > { %v1621_v31 = vpop.f32.mrf.mxu1 }
 0x32c   : > { %v1646_v32 = vpack.c.bf16 %v1621_v31, %v1621_v31 }
 0x32e   : > { %v1817_v34 = vsel %vm1583_vm2, %v1646_v32, 0 }
 0x32f   : > { %1826 = vmatpush.bf16.msra.mxu2 %v1817_v34 }
 0x331   : > { %v1470_v22 = vpop.permute.xlu0 %1469 }
 0x332   : > { %3527 = vmatmul.msk.bf16.vlgmr.msra.gmra.mxu2 %vm1558_vm3, %v4342_v49  ;;  %1494 = vst.msk [vmem:[#allocation2 + $0x8] sm:$0x3] %vm1492_vm8, %v1470_v22  ;;  %v1468_v30 = vpop.permute.xlu1 %1467 }
 0x333   : > { %v1623_v35 = vpop.f32.mrf.mxu1  ;;  %1493 = vst.msk [vmem:[#allocation2 + $0x4] sm:$0x3] %vm1492_vm8, %v1468_v30 }
 0x334   : > { %v1647_v36 = vpack.c.bf16 %v1623_v35, %v1623_v35 }
 0x336   : > { %v1833_v39 = vsel %vm1583_vm2, %v1647_v36, 0 }
 0x337   : > { %1842 = vmatpush.bf16.msra.mxu3 %v1833_v39 }
 0x338   : > { %v1482_v35 = vpop.permute.xlu2 %1481 }
 0x339   : > { %1500 = vst.msk [vmem:[#allocation2 + $0x20] sm:$0x3] %vm1492_vm8, %v1482_v35 }
 0x33a   : > { %3528 = vmatmul.msk.bf16.vlgmr.msra.gmra.mxu3 %vm1558_vm3, %v4342_v49 }
 0x33b   : > { %v1626_v42 = vpop.f32.mrf.mxu1 }
 0x33c   : > { %v1648_v44 = vpack.c.bf16 %v1626_v42, %v1626_v42 }
 0x33e   : > { %v1849_v47 = vsel %vm1583_vm2, %v1648_v44, 0 }
 0x33f   : > { %1858 = vmatpush.bf16.msrb.mxu2 %v1849_v47 }
 0x342   : > { %3529 = vmatmul.msk.bf16.vlgmr.msrb.gmra.mxu2 %vm1558_vm3, %v4342_v49 }
 0x343   : > { %v1628_v48 = vpop.f32.mrf.mxu1 }
 0x344   : > { %v1649_v50 = vpack.c.bf16 %v1628_v48, %v1628_v48 }
 0x346   : > { %v1865_v26 = vsel %vm1583_vm2, %v1649_v50, 0 }
 0x347   : > { %1874 = vmatpush.bf16.msrb.mxu3 %v1865_v26 }
 0x34a   : > { %3530 = vmatmul.msk.bf16.vlgmr.msrb.gmra.mxu3 %vm1558_vm3, %v4342_v49 }
 0x34b   : > { %v1631_v51 = vpop.f32.mrf.mxu1 }
 0x34c   : > { %v1650_v52 = vpack.c.bf16 %v1631_v51, %v1631_v51 }
 0x34e   : > { %v1881_v54 = vsel %vm1583_vm2, %v1650_v52, 0 }
 0x34f   : > { %1890 = vmatpush.bf16.msra.mxu2 %v1881_v54 }
 0x352   : > { %3531 = vmatmul.msk.bf16.vlgmr.msra.gmra.mxu2 %vm1558_vm3, %v4342_v49 }
 0x353   : > { %v1633_v55 = vpop.f32.mrf.mxu1 }
 0x354   : > { %v1651_v43 = vpack.c.bf16 %v1633_v55, %v1633_v55 }
 0x356   : > { %v1897_v56 = vsel %vm1583_vm2, %v1651_v43, 0 }
 0x357   : > { %1906 = vmatpush.bf16.msra.mxu3 %v1897_v56 }
 0x35a   : > { %3532 = vmatmul.msk.bf16.vlgmr.msra.gmra.mxu3 %vm1558_vm3, %v4342_v49 }
 0x365   : > { %v1668_v57 = vpop.f32.mrf.mxu2 }
 0x366   : > { %v1914_v60 = vrot.slane %v1668_v57, 4 }
 0x36d   : > { %v1670_v58 = vpop.f32.mrf.mxu2  ;;  %v1684_v59 = vpop.f32.mrf.mxu3 }
 0x36e   : > { %v1926_v3 = vrot.slane %v1684_v59, 4 }
 0x375   : > { %v1686_v61 = vpop.f32.mrf.mxu3  ;;  %v1700_v62 = vpop.f32.mrf.mxu2 }
 0x376   : > { %v1912_v63 = vrot.slane %v1700_v62, 4  ;;  %v1915_v0 = vsel %vm1055_vm1, %v1700_v62, %v1914_v60 }
 0x377   : > { %v1923_v2 = vperm.slane %v1915_v0, %v4151_v8 }
 0x378   : > { %v1913_v1 = vsel %vm1055_vm1, %v1912_v63, %v1668_v57  ;;  %v1476_v57 = vpop.permute.xlu0 %1475 }
 0x379   : > { %v1919_v4 = vperm.slane %v1913_v1, %v4151_v8  ;;  %v1974_v9 = vrot.slane %v1923_v2, 4  ;;  %1497 = vst.msk [vmem:[#allocation2 + $0x14] sm:$0x3] %vm1492_vm8, %v1476_v57  ;;  %v1474_v1 = vpop.permute.xlu1 %1473 }
 0x37a   : > { %1496 = vst.msk [vmem:[#allocation2 + $0x10] sm:$0x3] %vm1492_vm8, %v1474_v1 }
 0x37b   : > { %v1962_v15 = vrot.slane %v1919_v4, 4 }
 0x37d   : > { %v1702_v5 = vpop.f32.mrf.mxu2  ;;  %v1716_v6 = vpop.f32.mrf.mxu3 }
 0x37e   : > { %v1924_v7 = vrot.slane %v1716_v6, 4  ;;  %v1927_v49 = vsel %vm1055_vm1, %v1716_v6, %v1926_v3 }
 0x37f   : > { %v1935_v10 = vperm.slane %v1927_v49, %v4151_v8 }
 0x380   : > { %v1925_v11 = vsel %vm1055_vm1, %v1924_v7, %v1684_v59 }
 0x381   : > { %v1931_v16 = vperm.slane %v1925_v11, %v4151_v8  ;;  %v1972_v17 = vrot.slane %v1935_v10, 4  ;;  %v1975_v18 = vsel %vm1055_vm1, %v1935_v10, %v1974_v9 }
 0x382   : > { %v1983_v41 = vperm.slane %v1975_v18, %v4173_v53 }
 0x383   : > { %v1960_v19 = vrot.slane %v1931_v16, 4  ;;  %v1963_v20 = vsel %vm1055_vm1, %v1931_v16, %v1962_v15  ;;  %v1973_v23 = vsel %vm1055_vm1, %v1972_v17, %v1923_v2 }
 0x384   : > { %v1971_v45 = vperm.slane %v1963_v20, %v4173_v53  ;;  %v1979_v48 = vperm.slane %v1973_v23, %v4173_v53  ;;  %v2022_v43 = vrot.slane %v1983_v41, 4 }
 0x385   : > { %v1961_v27 = vsel %vm1055_vm1, %v1960_v19, %v1919_v4  ;;  %v1718_v21 = vpop.f32.mrf.mxu3  ;;  %v1732_v12 = vpop.f32.mrf.mxu2 }
 0x386   : > { %v1938_v14 = vrot.slane %v1732_v12, 4  ;;  %v1967_v55 = vperm.slane %v1961_v27, %v4173_v53  ;;  %v2014_v61 = vrot.slane %v1971_v45, 4  ;;  %v2018_v3 = vrot.slane %v1979_v48, 4 }
 0x388   : > { %v2010_v10 = vrot.slane %v1967_v55, 4 }
 0x38d   : > { %v1734_v28 = vpop.f32.mrf.mxu2  ;;  %v1748_v29 = vpop.f32.mrf.mxu3 }
 0x38e   : > { %v1950_v37 = vrot.slane %v1748_v29, 4 }
 0x395   : > { %v1750_v31 = vpop.f32.mrf.mxu3  ;;  %v1764_v32 = vpop.f32.mrf.mxu2 }
 0x396   : > { %v1936_v25 = vrot.slane %v1764_v32, 4  ;;  %v1939_v33 = vsel %vm1055_vm1, %v1764_v32, %v1938_v14 }
 0x397   : > { %v1947_v36 = vperm.slane %v1939_v33, %v4151_v8 }
 0x398   : > { %v1937_v34 = vsel %vm1055_vm1, %v1936_v25, %v1732_v12  ;;  %v1480_v12 = vpop.permute.xlu0 %1479 }
 0x399   : > { %v1943_v38 = vperm.slane %v1937_v34, %v4151_v8  ;;  %v1998_v46 = vrot.slane %v1947_v36, 4  ;;  %1499 = vst.msk [vmem:[#allocation2 + $0x1c] sm:$0x3] %vm1492_vm8, %v1480_v12 }
 0x39b   : > { %v1986_v26 = vrot.slane %v1943_v38, 4 }
 0x39d   : > { %v1766_v39 = vpop.f32.mrf.mxu2  ;;  %v1780_v40 = vpop.f32.mrf.mxu3 }
 0x39e   : > { %v1948_v42 = vrot.slane %v1780_v40, 4  ;;  %v1951_v44 = vsel %vm1055_vm1, %v1780_v40, %v1950_v37 }
 0x39f   : > { %v1959_v47 = vperm.slane %v1951_v44, %v4151_v8 }
 0x3a0   : > { %v1949_v50 = vsel %vm1055_vm1, %v1948_v42, %v1748_v29 }
 0x3a1   : > { %v1955_v51 = vperm.slane %v1949_v50, %v4151_v8  ;;  %v1996_v52 = vrot.slane %v1959_v47, 4  ;;  %v1999_v54 = vsel %vm1055_vm1, %v1959_v47, %v1998_v46 }
 0x3a2   : > { %v2007_v56 = vperm.slane %v1999_v54, %v4173_v53 }
 0x3a3   : > { %v1984_v58 = vrot.slane %v1955_v51, 4  ;;  %v1987_v59 = vsel %vm1055_vm1, %v1955_v51, %v1986_v26  ;;  %v1997_v60 = vsel %vm1055_vm1, %v1996_v52, %v1947_v36 }
 0x3a4   : > { %v1995_v62 = vperm.slane %v1987_v59, %v4173_v53  ;;  %v2003_v63 = vperm.slane %v1997_v60, %v4173_v53  ;;  %v2020_v0 = vrot.slane %v2007_v56, 4  ;;  %v2023_v2 = vsel %vm1055_vm1, %v2007_v56, %v2022_v43 }
 0x3a5   : > { %v1985_v4 = vsel %vm1055_vm1, %v1984_v58, %v1943_v38  ;;  %v1782_v5 = vpop.f32.mrf.mxu3  ;;  %v1796_v6 = vpop.f32.mrf.mxu2 }
 0x3a6   : > { %v2016_v7 = vrot.slane %v2003_v63, 4  ;;  %v2015_v49 = vsel %vm1055_vm1, %v1995_v62, %v2014_v61  ;;  %v1991_v9 = vperm.slane %v1985_v4, %v4173_v53  ;;  %v2012_v11 = vrot.slane %v1995_v62, 4 }
 0x3a7   : > { %v4445_v15 = vsel %vm1055_vm1, %v2003_v63, %v2018_v3  ;;  %v4451_v17 = vsel %vm1055_vm1, %v2020_v0, %v1983_v41  ;;  %v2026_v33 = vrot.slane %v1796_v6, 4  ;;  %v2142_v26 = vpack.c.bf16 %v2015_v49, %v2015_v49 }
 0x3a8   : > { %v4448_v16 = vsel %vm1055_vm1, %v1991_v9, %v2010_v10  ;;  %v2008_v18 = vrot.slane %v1991_v9, 4  ;;  %v4454_v19 = vsel %vm1055_vm1, %v2012_v11, %v1971_v45  ;;  %v4460_v23 = vsel %vm1055_vm1, %v2016_v7, %v1979_v48 }
 0x3a9   : > { %v2150_v48 = vpack.c.bf16 %v2023_v2, %v2023_v2  ;;  %v4478_v61 = vunpack.c.l.b16 %v2142_v26  ;;  %v2146_v62 = vpack.c.bf16 %v4445_v15, %v4445_v15  ;;  %v2138_v4 = vpack.c.bf16 %v4448_v16, %v4448_v16 }
 0x3aa   : > { %v4457_v20 = vsel %vm1055_vm1, %v2008_v18, %v1967_v55  ;;  %v2148_v49 = vpack.c.bf16 %v4451_v17, %v4451_v17  ;;  %v2140_v15 = vpack.c.bf16 %v4454_v19, %v4454_v19 }
 0x3ab   : > { %v4475_v58 = vunpack.c.l.b16 %v2150_v48  ;;  %v2136_v19 = vpack.c.bf16 %v4457_v20, %v4457_v20 }
 0x3ad   : > { %v1798_v27 = vpop.f32.mrf.mxu2  ;;  %v1812_v21 = vpop.f32.mrf.mxu3 }
 0x3ae   : > { %v2038_v34 = vrot.slane %v1812_v21, 4 }
 0x3b5   : > { %v1814_v13 = vpop.f32.mrf.mxu3  ;;  %v1828_v24 = vpop.f32.mrf.mxu2 }
 0x3b6   : > { %v2024_v25 = vrot.slane %v1828_v24, 4  ;;  %v2027_v35 = vsel %vm1055_vm1, %v1828_v24, %v2026_v33 }
 0x3b7   : > { %v2035_v39 = vperm.slane %v2027_v35, %v4151_v8 }
 0x3b8   : > { %v2025_v38 = vsel %vm1055_vm1, %v2024_v25, %v1796_v6 }
 0x3b9   : > { %v2031_v45 = vperm.slane %v2025_v38, %v4151_v8  ;;  %v2086_v51 = vrot.slane %v2035_v39, 4 }
 0x3bb   : > { %v2074_v55 = vrot.slane %v2031_v45, 4 }
 0x3bd   : > { %v1830_v28 = vpop.f32.mrf.mxu2  ;;  %v1844_v29 = vpop.f32.mrf.mxu3 }
 0x3be   : > { %v2036_v32 = vrot.slane %v1844_v29, 4  ;;  %v2039_v37 = vsel %vm1055_vm1, %v1844_v29, %v2038_v34 }
 0x3bf   : > { %v2047_v41 = vperm.slane %v2039_v37, %v4151_v8 }
 0x3c0   : > { %v2037_v36 = vsel %vm1055_vm1, %v2036_v32, %v1812_v21  ;;  %v4498_v21 = vunpack.c.l.b16 %v2146_v62 }
 0x3c1   : > { %v2043_v40 = vperm.slane %v2037_v36, %v4151_v8  ;;  %v2084_v54 = vrot.slane %v2047_v41, 4  ;;  %v2087_v56 = vsel %vm1055_vm1, %v2047_v41, %v2086_v51 }
 0x3c2   : > { %v2095_v5 = vperm.slane %v2087_v56, %v4173_v53  ;;  %v2197_v56 = vunpack.c.l.b16 %v2140_v15 }
 0x3c3   : > { %v2072_v52 = vrot.slane %v2043_v40, 4  ;;  %v2075_v59 = vsel %vm1055_vm1, %v2043_v40, %v2074_v55  ;;  %v2085_v0 = vsel %vm1055_vm1, %v2084_v54, %v2035_v39 }
 0x3c4   : > { %v2083_v9 = vperm.slane %v2075_v59, %v4173_v53  ;;  %v2091_v16 = vperm.slane %v2085_v0, %v4173_v53  ;;  %v2134_v28 = vrot.slane %v2095_v5, 4 }
 0x3c5   : > { %v1846_v22 = vpop.f32.mrf.mxu3  ;;  %v1860_v14 = vpop.f32.mrf.mxu2  ;;  %v2073_v63 = vsel %vm1055_vm1, %v2072_v52, %v2031_v45 }
 0x3c6   : > { %v2050_v46 = vrot.slane %v1860_v14, 4  ;;  %v2079_v18 = vperm.slane %v2073_v63, %v4173_v53  ;;  %v2178_v22 = vunpack.c.l.b16 %v2138_v4  ;;  %v2126_v32 = vrot.slane %v2083_v9, 4 }
 0x3c7   : > { %v2130_v36 = vrot.slane %v2091_v16, 4  ;;  %v2273_v4 = vunpack.c.l.b16 %v2148_v49 }
 0x3c8   : > { %v2122_v40 = vrot.slane %v2079_v18, 4 }
 0x3cd   : > { %v1862_v30 = vpop.f32.mrf.mxu2  ;;  %v1876_v31 = vpop.f32.mrf.mxu3 }
 0x3ce   : > { %v2062_v60 = vrot.slane %v1876_v31, 4 }
 0x3d5   : > { %v1878_v42 = vpop.f32.mrf.mxu3  ;;  %v1892_v44 = vpop.f32.mrf.mxu2 }
 0x3d6   : > { %v2048_v47 = vrot.slane %v1892_v44, 4  ;;  %v2051_v50 = vsel %vm1055_vm1, %v1892_v44, %v2050_v46 }
 0x3d7   : > { %v2059_v57 = vperm.slane %v2051_v50, %v4151_v8 }
 0x3d8   : > { %v2049_v43 = vsel %vm1055_vm1, %v2048_v47, %v1860_v14 }
 0x3d9   : > { %v2055_v1 = vperm.slane %v2049_v43, %v4151_v8  ;;  %v2110_v10 = vrot.slane %v2059_v57, 4 }
 0x3db   : > { %v2098_v12 = vrot.slane %v2055_v1, 4 }
 0x3dd   : > { %v1908_v2 = vpop.f32.mrf.mxu3  ;;  %v1894_v3 = vpop.f32.mrf.mxu2 }
 0x3de   : > { %v2060_v6 = vrot.slane %v1908_v2, 4  ;;  %v2063_v7 = vsel %vm1055_vm1, %v1908_v2, %v2062_v60 }
 0x3df   : > { %v2071_v11 = vperm.slane %v2063_v7, %v4151_v8 }
 0x3e0   : > { %v2061_v27 = vsel %vm1055_vm1, %v2060_v6, %v1876_v31  ;;  %v2144_v6 = vpack.c.bf16 %v4460_v23, %v4460_v23 }
 0x3e1   : > { %v2067_v13 = vperm.slane %v2061_v27, %v4151_v8  ;;  %v2108_v17 = vrot.slane %v2071_v11, 4  ;;  %v2111_v24 = vsel %vm1055_vm1, %v2071_v11, %v2110_v10 }
 0x3e2   : > { %v2119_v29 = vperm.slane %v2111_v24, %v4173_v53  ;;  %v2235_v23 = vunpack.c.l.b16 %v2144_v6 }
 0x3e3   : > { %v2096_v14 = vrot.slane %v2067_v13, 4  ;;  %v2099_v30 = vsel %vm1055_vm1, %v2067_v13, %v2098_v12  ;;  %v2109_v31 = vsel %vm1055_vm1, %v2108_v17, %v2059_v57 }
 0x3e4   : > { %v2107_v25 = vperm.slane %v2099_v30, %v4173_v53  ;;  %v2115_v33 = vperm.slane %v2109_v31, %v4173_v53  ;;  %v2132_v34 = vrot.slane %v2119_v29, 4  ;;  %v2135_v35 = vsel %vm1055_vm1, %v2119_v29, %v2134_v28 }
 0x3e5   : > { %v2097_v37 = vsel %vm1055_vm1, %v2096_v14, %v2055_v1  ;;  %v1910_v38 = vpop.f32.mrf.mxu3  ;;  %v2151_v39 = vpack.c.bf16 %v2135_v35, %v2135_v35 }
 0x3e6   : > { %v2128_v20 = vrot.slane %v2115_v33, 4  ;;  %v2127_v41 = vsel %vm1055_vm1, %v2107_v25, %v2126_v32  ;;  %v2103_v42 = vperm.slane %v2097_v37, %v4173_v53  ;;  %v2124_v44 = vrot.slane %v2107_v25, 4 }
 0x3e7   : > { %v2143_v45 = vpack.c.bf16 %v2127_v41, %v2127_v41  ;;  %v2293_v46 = vunpack.c.l.b16 %v2151_v39  ;;  %v2131_v47 = vsel %vm1055_vm1, %v2115_v33, %v2130_v36  ;;  %v2133_v48 = vsel %vm1055_vm1, %v2132_v34, %v2095_v5 }
 0x3e8   : > { %v2123_v50 = vsel %vm1055_vm1, %v2103_v42, %v2122_v40  ;;  %v2125_v26 = vsel %vm1055_vm1, %v2124_v44, %v2083_v9  ;;  %v2147_v51 = vpack.c.bf16 %v2131_v47, %v2131_v47  ;;  %v2149_v52 = vpack.c.bf16 %v2133_v48, %v2133_v48 }
 0x3e9   : > { %v2217_v54 = vunpack.c.l.b16 %v2143_v45  ;;  %v2139_v55 = vpack.c.bf16 %v2123_v50, %v2123_v50  ;;  %v2141_v43 = vpack.c.bf16 %v2125_v26, %v2125_v26  ;;  %v2120_v60 = vrot.slane %v2103_v42, 4 }
 0x3ea   : > { %v2255_v57 = vunpack.c.l.b16 %v2147_v51  ;;  %v2274_v59 = vunpack.c.l.b16 %v2149_v52  ;;  %v2129_v62 = vsel %vm1055_vm1, %v2128_v20, %v2091_v16  ;;  %v2294_v3 = vpack.c.b16 %v2293_v46, %v4475_v58  ;;  %v3533_v58 = vld [vmem:[%s4756_s2 + $0x2] sm:$0x3]  ;;  %v2599_v52 = vld [vmem:[#allocation2 + $0x24] sm:$0xf] }
 0x3eb   : > { %v2218_v63 = vpack.c.b16 %v2217_v54, %v4478_v61  ;;  %v2179_v0 = vunpack.c.l.b16 %v2139_v55  ;;  %v2198_v1 = vunpack.c.l.b16 %v2141_v43  ;;  %v2145_v2 = vpack.c.bf16 %v2129_v62, %v2129_v62  ;;  %v2366_v51 = vld [vmem:[#allocation2] sm:$0xf]  ;;  %2607 = vst.msk [vmem:[#allocation3 + $0x114] sm:$0xf] %vm2374_vm7, %v2599_v52 }
 0x3ec   : > { %v2121_v5 = vsel %vm1055_vm1, %v2120_v60, %v2079_v18  ;;  %v2256_v11 = vpack.c.b16 %v2255_v57, %v4498_v21  ;;  %v2275_v15 = vpack.c.b16 %v2274_v59, %v2273_v4  ;;  %v2156_v16 = vunpack.c.l.b16 %v2136_v19  ;;  %2375 = vst.msk [vmem:[#allocation3] sm:$0xf] %vm2374_vm7, %v2366_v51 }
 0x3ed   : > { %2227 = vmatpush.bf16.msrb.mxu3 %v2218_v63  ;;  %v2180_v7 = vpack.c.b16 %v2179_v0, %v2178_v22  ;;  %v2199_v9 = vpack.c.b16 %v2198_v1, %v2197_v56  ;;  %v2137_v10 = vpack.c.bf16 %v2121_v5, %v2121_v5  ;;  %v2236_v61 = vunpack.c.l.b16 %v2145_v2 }
 0x3ef   : > { %2189 = vmatpush.bf16.msra.mxu1 %v2180_v7  ;;  %2208 = vmatpush.bf16.msrb.mxu2 %v2199_v9  ;;  %v2157_v27 = vunpack.c.l.b16 %v2137_v10  ;;  %v2237_v18 = vpack.c.b16 %v2236_v61, %v2235_v23 }
 0x3f0   : > { %3537 = vmatmul.msk.bf16.vlgmr.msrb.gmra.mxu3 %vm576_vm0, %v3533_v58 }
 0x3f1   : > { %2303 = vmatpush.bf16.msra.mxu3 %v2294_v3  ;;  %v2158_v49 = vpack.c.b16 %v2157_v27, %v2156_v16 }
 0x3f2   : > { %3535 = vmatmul.msk.bf16.vlgmr.msra.gmra.mxu1 %vm576_vm0, %v3533_v58  ;;  %3536 = vmatmul.msk.bf16.vlgmr.msrb.gmra.mxu2 %vm576_vm0, %v3533_v58 }
 0x3f3   : > { %2265 = vmatpush.bf16.msrb.mxu1 %v2256_v11  ;;  %2284 = vmatpush.bf16.msra.mxu2 %v2275_v15 }
 0x3f4   : > { %2170 = vmatpush.bf16.msrb.mxu0 %v2158_v49 }
 0x3f7   : > { %3534 = vmatmul.msk.bf16.vlgmr.msrb.gmra.mxu0 %vm576_vm0, %v3533_v58 }
 0x3f8   : > { %2246 = vmatpush.bf16.msra.mxu0 %v2237_v18 }
 0x400   : > { %3541 = vmatmul.msk.bf16.vlgmr.msra.gmra.mxu3 %vm576_vm0, %v3533_v58 }
 0x402   : > { %3539 = vmatmul.msk.bf16.vlgmr.msrb.gmra.mxu1 %vm576_vm0, %v3533_v58  ;;  %3540 = vmatmul.msk.bf16.vlgmr.msra.gmra.mxu2 %vm576_vm0, %v3533_v58 }
 0x407   : > { %3538 = vmatmul.msk.bf16.vlgmr.msra.gmra.mxu0 %vm576_vm0, %v3533_v58 }
 0x46f   : > { %v2191_v21 = vpop.f32.mrf.mxu1 }
 0x470   : > { %v2310_v12 = vpack.c.bf16 %v2191_v21, %v2191_v21 }
 0x472   : > { %v2326_v13 = vrot.slane %v2310_v12, 6 }
 0x473   : > { %v2229_v28 = vpop.f32.mrf.mxu3 }
 0x474   : > { %v2172_v17 = vpop.f32.mrf.mxu0  ;;  %2335 = vrot.lane.b32.xlu1 %v2326_v13, %s3921_s27  ;;  %v2312_v22 = vpack.c.bf16 %v2229_v28, %v2229_v28 }
 0x475   : > { %v2309_v24 = vpack.c.bf16 %v2172_v17, %v2172_v17  ;;  %v2210_v29 = vpop.f32.mrf.mxu2 }
 0x476   : > { %v2311_v30 = vpack.c.bf16 %v2210_v29, %v2210_v29  ;;  %v2328_v31 = vrot.slane %v2312_v22, 6 }
 0x477   : > { %v2325_v19 = vrot.slane %v2309_v24, 6  ;;  %v2193_v14 = vpop.f32.mrf.mxu1 }
 0x478   : > { %v2327_v25 = vrot.slane %v2311_v30, 6 }
 0x479   : > { %2333 = vrot.lane.b32.xlu2 %v2325_v19, %s3921_s27 }
 0x47b   : > { %v2231_v33 = vpop.f32.mrf.mxu3 }
 0x47c   : > { %v2174_v32 = vpop.f32.mrf.mxu0  ;;  %2339 = vrot.lane.b32.xlu1 %v2328_v31, %s3921_s27 }
 0x47d   : > { %v2212_v34 = vpop.f32.mrf.mxu2 }
 0x47f   : > { %v2267_v35 = vpop.f32.mrf.mxu1 }
 0x480   : > { %v2314_v36 = vpack.c.bf16 %v2267_v35, %v2267_v35 }
 0x481   : > { %2337 = vrot.lane.b32.xlu2 %v2327_v25, %s3921_s27 }
 0x482   : > { %v2330_v37 = vrot.slane %v2314_v36, 6 }
 0x483   : > { %v2305_v40 = vpop.f32.mrf.mxu3 }
 0x484   : > { %v2248_v38 = vpop.f32.mrf.mxu0  ;;  %2343 = vrot.lane.b32.xlu0 %v2330_v37, %s3921_s27  ;;  %v2316_v47 = vpack.c.bf16 %v2305_v40, %v2305_v40 }
 0x485   : > { %v2313_v39 = vpack.c.bf16 %v2248_v38, %v2248_v38  ;;  %v2286_v20 = vpop.f32.mrf.mxu2 }
 0x486   : > { %v2315_v41 = vpack.c.bf16 %v2286_v20, %v2286_v20  ;;  %v2332_v26 = vrot.slane %v2316_v47, 6 }
 0x487   : > { %v2269_v42 = vpop.f32.mrf.mxu1  ;;  %v2329_v45 = vrot.slane %v2313_v39, 6 }
 0x488   : > { %v2331_v44 = vrot.slane %v2315_v41, 6 }
 0x48a   : > { %2345 = vrot.lane.b32.xlu1 %v2331_v44, %s3921_s27 }
 0x48b   : > { %v2307_v48 = vpop.f32.mrf.mxu3 }
 0x48c   : > { %v2250_v46 = vpop.f32.mrf.mxu0  ;;  %2341 = vrot.lane.b32.xlu0 %v2329_v45, %s3921_s27 }
 0x48d   : > { %v2288_v50 = vpop.f32.mrf.mxu2 }
 0x494   : > { %2347 = vrot.lane.b32.xlu0 %v2332_v26, %s3921_s27 }
 0x4d3   : > { %v2334_v54 = vpop.permute.xlu2 %2333 }
 0x4d4   : > { %2358 = vst.msk [vmem:[#allocation2 + $0x4] sm:$0xc] %vm2357_vm9, %v2334_v54 }
 0x4db   : > { %v2367_v55 = vld [vmem:[#allocation2 + $0x4] sm:$0xf]  ;;  %v2338_v56 = vpop.permute.xlu2 %2337 }
 0x4dc   : > { %v2479_v43 = vld [vmem:[#allocation2 + $0x4] sm:$0xf]  ;;  %2376 = vst.msk [vmem:[#allocation3 + $0x24] sm:$0xf] %vm2374_vm7, %v2367_v55 }
 0x4dd   : > { %2487 = vst.msk [vmem:[#allocation3 + $0xc] sm:$0xf] %vm2374_vm7, %v2479_v43  ;;  %v2543_v9 = vld [vmem:[#allocation2 + $0x4] sm:$0xf] }
 0x4de   : > { %2360 = vst.msk [vmem:[#allocation2 + $0xc] sm:$0xc] %vm2357_vm9, %v2338_v56  ;;  %v2432_v12 = vld [vmem:[#allocation2 + $0x4] sm:$0xf] }
 0x4df   : > { %v2495_v17 = vld [vmem:[#allocation2 + $0x4] sm:$0xf] }
 0x4e0   : > { %v2384_v24 = vld [vmem:[#allocation2 + $0x4] sm:$0xf] }
 0x4e5   : > { %v2369_v57 = vld [vmem:[#allocation2 + $0xc] sm:$0xf] }
 0x4e6   : > { %v2481_v59 = vld [vmem:[#allocation2 + $0xc] sm:$0xf]  ;;  %2378 = vst.msk [vmem:[#allocation3 + $0x6c] sm:$0xf] %vm2374_vm7, %v2369_v57  ;;  %v2336_v62 = vpop.permute.xlu1 %2335 }
 0x4e7   : > { %v2593_v60 = vld [vmem:[#allocation2 + $0xc] sm:$0xf]  ;;  %2489 = vst.msk [vmem:[#allocation3 + $0x54] sm:$0xf] %vm2374_vm7, %v2481_v59 }
 0x4e8   : > { %2601 = vst.msk [vmem:[#allocation3 + $0x3c] sm:$0xf] %vm2374_vm7, %v2593_v60  ;;  %v2657_v28 = vld [vmem:[#allocation2 + $0xc] sm:$0xf] }
 0x4e9   : > { %2359 = vst.msk [vmem:[#allocation2 + $0x8] sm:$0xc] %vm2357_vm9, %v2336_v62  ;;  %v2545_v33 = vld [vmem:[#allocation2 + $0xc] sm:$0xf] }
 0x4ea   : > { %v2497_v34 = vld [vmem:[#allocation2 + $0xc] sm:$0xf] }
 0x4eb   : > { %v2609_v37 = vld [vmem:[#allocation2 + $0xc] sm:$0xf] }
 0x4ec   : > { %v2434_v44 = vld [vmem:[#allocation2 + $0xc] sm:$0xf] }
 0x4ed   : > { %v2386_v47 = vld [vmem:[#allocation2 + $0xc] sm:$0xf] }
 0x4ee   : > { %v2340_v2 = vpop.permute.xlu1 %2339 }
 0x4ef   : > { %2361 = vst.msk [vmem:[#allocation2 + $0x10] sm:$0xc] %vm2357_vm9, %v2340_v2 }
 0x4f0   : > { %v2368_v63 = vld [vmem:[#allocation2 + $0x8] sm:$0xf] }
 0x4f1   : > { %v2480_v0 = vld [vmem:[#allocation2 + $0x8] sm:$0xf]  ;;  %2377 = vst.msk [vmem:[#allocation3 + $0x48] sm:$0xf] %vm2374_vm7, %v2368_v63 }
 0x4f2   : > { %v2592_v1 = vld [vmem:[#allocation2 + $0x8] sm:$0xf]  ;;  %2488 = vst.msk [vmem:[#allocation3 + $0x30] sm:$0xf] %vm2374_vm7, %v2480_v0 }
 0x4f3   : > { %v2656_v3 = vld [vmem:[#allocation2 + $0x8] sm:$0xf]  ;;  %2600 = vst.msk [vmem:[#allocation3 + $0x18] sm:$0xf] %vm2374_vm7, %v2592_v1 }
 0x4f4   : > { %v2544_v4 = vld [vmem:[#allocation2 + $0x8] sm:$0xf]  ;;  %2672 = vrot.lane.b32.xlu0 %v2656_v3, %s3919_s14 }
 0x4f5   : > { %2561 = vrot.lane.b32.xlu1 %v2544_v4, %s3919_s14  ;;  %v2433_v5 = vld [vmem:[#allocation2 + $0x8] sm:$0xf] }
 0x4f6   : > { %2451 = vrot.lane.b32.xlu2 %v2433_v5, %s3919_s14  ;;  %v2344_v6 = vpop.permute.xlu0 %2343  ;;  %v2608_v7 = vld [vmem:[#allocation2 + $0x8] sm:$0xf]  ;;  %v2370_v11 = vld [vmem:[#allocation2 + $0x10] sm:$0xf] }
 0x4f7   : > { %2363 = vst.msk [vmem:[#allocation2 + $0x18] sm:$0xc] %vm2357_vm9, %v2344_v6  ;;  %v2385_v10 = vld [vmem:[#allocation2 + $0x8] sm:$0xf]  ;;  %v2482_v15 = vld [vmem:[#allocation2 + $0x10] sm:$0xf] }
 0x4f8   : > { %v2594_v61 = vld [vmem:[#allocation2 + $0x10] sm:$0xf]  ;;  %2379 = vst.msk [vmem:[#allocation3 + $0x90] sm:$0xf] %vm2374_vm7, %v2370_v11  ;;  %v2496_v18 = vld [vmem:[#allocation2 + $0x8] sm:$0xf] }
 0x4f9   : > { %2490 = vst.msk [vmem:[#allocation3 + $0x78] sm:$0xf] %vm2374_vm7, %v2482_v15  ;;  %v2498_v21 = vld [vmem:[#allocation2 + $0x10] sm:$0xf] }
 0x4fa   : > { %2602 = vst.msk [vmem:[#allocation3 + $0x60] sm:$0xf] %vm2374_vm7, %v2594_v61  ;;  %v2658_v35 = vld [vmem:[#allocation2 + $0x10] sm:$0xf] }
 0x4fb   : > { %v2610_v38 = vld [vmem:[#allocation2 + $0x10] sm:$0xf] }
 0x4fc   : > { %2624 = vrot.lane.b32.xlu0 %v2608_v7, %s3920_s21  ;;  %v2346_v49 = vpop.permute.xlu1 %2345  ;;  %v2546_v20 = vld [vmem:[#allocation2 + $0x10] sm:$0xf] }
 0x4fd   : > { %2559 = vrot.lane.b32.xlu1 %v2543_v9, %s3919_s14  ;;  %2364 = vst.msk [vmem:[#allocation2 + $0x1c] sm:$0xc] %vm2357_vm9, %v2346_v49  ;;  %v2435_v4 = vld [vmem:[#allocation2 + $0x10] sm:$0xf] }
 0x4fe   : > { %2403 = vrot.lane.b32.xlu2 %v2385_v10, %s3920_s21  ;;  %v2372_v16 = vld [vmem:[#allocation2 + $0x18] sm:$0xf]  ;;  %v2342_v23 = vpop.permute.xlu0 %2341  ;;  %v2387_v5 = vld [vmem:[#allocation2 + $0x10] sm:$0xf] }
 0x4ff   : > { %v2484_v27 = vld [vmem:[#allocation2 + $0x18] sm:$0xf]  ;;  %2381 = vst.msk [vmem:[#allocation3 + $0xd8] sm:$0xf] %vm2374_vm7, %v2372_v16 }
 0x500   : > { %v2596_v58 = vld [vmem:[#allocation2 + $0x18] sm:$0xf]  ;;  %2492 = vst.msk [vmem:[#allocation3 + $0xc0] sm:$0xf] %vm2374_vm7, %v2484_v27 }
 0x501   : > { %2604 = vst.msk [vmem:[#allocation3 + $0xa8] sm:$0xf] %vm2374_vm7, %v2596_v58  ;;  %v2660_v36 = vld [vmem:[#allocation2 + $0x18] sm:$0xf] }
 0x502   : > { %2362 = vst.msk [vmem:[#allocation2 + $0x14] sm:$0xc] %vm2357_vm9, %v2342_v23  ;;  %v2437_v39 = vld [vmem:[#allocation2 + $0x18] sm:$0xf] }
 0x503   : > { %v2389_v40 = vld [vmem:[#allocation2 + $0x18] sm:$0xf] }
 0x504   : > { %2513 = vrot.lane.b32.xlu0 %v2496_v18, %s3920_s21  ;;  %v2373_v29 = vld [vmem:[#allocation2 + $0x1c] sm:$0xf]  ;;  %v2500_v41 = vld [vmem:[#allocation2 + $0x18] sm:$0xf] }
 0x505   : > { %2517 = vrot.lane.b32.xlu1 %v2498_v21, %s3920_s21  ;;  %v2485_v22 = vld [vmem:[#allocation2 + $0x1c] sm:$0xf]  ;;  %2382 = vst.msk [vmem:[#allocation3 + $0xfc] sm:$0xf] %vm2374_vm7, %v2373_v29  ;;  %v2612_v26 = vld [vmem:[#allocation2 + $0x18] sm:$0xf] }
 0x506   : > { %2449 = vrot.lane.b32.xlu2 %v2432_v12, %s3919_s14  ;;  %v2348_v13 = vpop.permute.xlu0 %2347  ;;  %v2597_v19 = vld [vmem:[#allocation2 + $0x1c] sm:$0xf]  ;;  %2493 = vst.msk [vmem:[#allocation3 + $0xe4] sm:$0xf] %vm2374_vm7, %v2485_v22  ;;  %v2548_v54 = vld [vmem:[#allocation2 + $0x18] sm:$0xf] }
 0x507   : > { %2365 = vst.msk [vmem:[#allocation2 + $0x20] sm:$0xc] %vm2357_vm9, %v2348_v13  ;;  %v2501_v52 = vld [vmem:[#allocation2 + $0x1c] sm:$0xf] }
 0x508   : > { %2605 = vst.msk [vmem:[#allocation3 + $0xcc] sm:$0xf] %vm2374_vm7, %v2597_v19  ;;  %v2661_v55 = vld [vmem:[#allocation2 + $0x1c] sm:$0xf] }
 0x509   : > { %v2371_v14 = vld [vmem:[#allocation2 + $0x14] sm:$0xf]  ;;  %v2613_v43 = vld [vmem:[#allocation2 + $0x1c] sm:$0xf] }
 0x50a   : > { %v2483_v30 = vld [vmem:[#allocation2 + $0x14] sm:$0xf]  ;;  %2380 = vst.msk [vmem:[#allocation3 + $0xb4] sm:$0xf] %vm2374_vm7, %v2371_v14  ;;  %v2438_v56 = vld [vmem:[#allocation2 + $0x1c] sm:$0xf] }
 0x50b   : > { %v2595_v31 = vld [vmem:[#allocation2 + $0x14] sm:$0xf]  ;;  %2491 = vst.msk [vmem:[#allocation3 + $0x9c] sm:$0xf] %vm2374_vm7, %v2483_v30  ;;  %v2549_v59 = vld [vmem:[#allocation2 + $0x1c] sm:$0xf] }
 0x50c   : > { %2511 = vrot.lane.b32.xlu0 %v2495_v17, %s3920_s21  ;;  %2603 = vst.msk [vmem:[#allocation3 + $0x84] sm:$0xf] %vm2374_vm7, %v2595_v31  ;;  %v2611_v42 = vld [vmem:[#allocation2 + $0x14] sm:$0xf]  ;;  %v2390_v60 = vld [vmem:[#allocation2 + $0x1c] sm:$0xf] }
 0x50d   : > { %2674 = vrot.lane.b32.xlu1 %v2657_v28, %s3919_s14  ;;  %v2659_v45 = vld [vmem:[#allocation2 + $0x14] sm:$0xf] }
 0x50e   : > { %2401 = vrot.lane.b32.xlu2 %v2384_v24, %s3920_s21  ;;  %v2486_v32 = vld [vmem:[#allocation2 + $0x20] sm:$0xf]  ;;  %v2547_v62 = vld [vmem:[#allocation2 + $0x14] sm:$0xf] }
 0x50f   : > { %v2598_v25 = vld [vmem:[#allocation2 + $0x20] sm:$0xf]  ;;  %2494 = vst.msk [vmem:[#allocation3 + $0x108] sm:$0xf] %vm2374_vm7, %v2486_v32  ;;  %v2499_v0 = vld [vmem:[#allocation2 + $0x14] sm:$0xf] }
 0x510   : > { %2606 = vst.msk [vmem:[#allocation3 + $0xf0] sm:$0xf] %vm2374_vm7, %v2598_v25  ;;  %v2614_v46 = vld [vmem:[#allocation2 + $0x20] sm:$0xf]  ;;  %v2436_v1 = vld [vmem:[#allocation2 + $0x14] sm:$0xf] }
 0x511   : > { %v2662_v48 = vld [vmem:[#allocation2 + $0x20] sm:$0xf]  ;;  %v2388_v2 = vld [vmem:[#allocation2 + $0x14] sm:$0xf] }
 0x512   : > { %v2502_v50 = vld [vmem:[#allocation2 + $0x20] sm:$0xf] }
 0x513   : > { %v2550_v51 = vld [vmem:[#allocation2 + $0x20] sm:$0xf] }
 0x514   : > { %2515 = vrot.lane.b32.xlu0 %v2497_v34, %s3920_s21 }
 0x515   : > { %2563 = vrot.lane.b32.xlu1 %v2545_v33, %s3919_s14 }
 0x516   : > { %2676 = vrot.lane.b32.xlu2 %v2658_v35, %s3919_s14  ;;  %v3723_v35 = vld [vmem:[#allocation3 + $0x8] sm:$0xff] }
 0x51c   : > { %2626 = vrot.lane.b32.xlu0 %v2609_v37, %s3920_s21 }
 0x51d   : > { %2680 = vrot.lane.b32.xlu1 %v2660_v36, %s3919_s14 }
 0x51e   : > { %2628 = vrot.lane.b32.xlu2 %v2610_v38, %s3920_s21 }
 0x524   : > { %2411 = vrot.lane.b32.xlu0 %v2389_v40, %s3920_s21 }
 0x525   : > { %2459 = vrot.lane.b32.xlu1 %v2437_v39, %s3919_s14  ;;  %v3722_v39 = vld [vmem:[#allocation3] sm:$0xff] }
 0x526   : > { %2565 = vrot.lane.b32.xlu2 %v2546_v20, %s3919_s14 }
 0x52c   : > { %2630 = vrot.lane.b32.xlu0 %v2611_v42, %s3920_s21 }
 0x52d   : > { %2521 = vrot.lane.b32.xlu1 %v2500_v41, %s3920_s21 }
 0x52e   : > { %2453 = vrot.lane.b32.xlu2 %v2434_v44, %s3919_s14 }
 0x534   : > { %2636 = vrot.lane.b32.xlu0 %v2614_v46, %s3920_s21 }
 0x535   : > { %2678 = vrot.lane.b32.xlu1 %v2659_v45, %s3919_s14 }
 0x536   : > { %2405 = vrot.lane.b32.xlu2 %v2386_v47, %s3920_s21 }
 0x53c   : > { %2525 = vrot.lane.b32.xlu0 %v2502_v50, %s3920_s21 }
 0x53d   : > { %2684 = vrot.lane.b32.xlu1 %v2662_v48, %s3919_s14 }
 0x53e   : > { %2632 = vrot.lane.b32.xlu2 %v2612_v26, %s3920_s21 }
 0x544   : > { %2523 = vrot.lane.b32.xlu0 %v2501_v52, %s3920_s21 }
 0x545   : > { %2573 = vrot.lane.b32.xlu1 %v2550_v51, %s3919_s14 }
 0x546   : > { %2569 = vrot.lane.b32.xlu2 %v2548_v54, %s3919_s14 }
 0x54c   : > { %2634 = vrot.lane.b32.xlu0 %v2613_v43, %s3920_s21 }
 0x54d   : > { %2682 = vrot.lane.b32.xlu1 %v2661_v55, %s3919_s14 }
 0x54e   : > { %2461 = vrot.lane.b32.xlu2 %v2438_v56, %s3919_s14 }
 0x550   : > { %v2452_v57 = vpop.permute.xlu2 %2451 }
 0x551   : > { %2473 = vst.msk [vmem:[#allocation3 + $0x50] sm:$0xf] %vm2374_vm7, %v2452_v57 }
 0x554   : > { %2413 = vrot.lane.b32.xlu0 %v2390_v60, %s3920_s21 }
 0x555   : > { %2571 = vrot.lane.b32.xlu1 %v2549_v59, %s3919_s14 }
 0x556   : > { %2567 = vrot.lane.b32.xlu2 %v2547_v62, %s3919_s14 }
 0x558   : > { %v2404_v63 = vpop.permute.xlu2 %2403  ;;  %v3731_v41 = vld [vmem:[#allocation3 + $0x50] sm:$0xff] }
 0x559   : > { %2425 = vst.msk [vmem:[#allocation3 + $0x4c] sm:$0xf] %vm2374_vm7, %v2404_v63 }
 0x55c   : > { %2457 = vrot.lane.b32.xlu0 %v2436_v1, %s3919_s14 }
 0x55d   : > { %2519 = vrot.lane.b32.xlu1 %v2499_v0, %s3920_s21 }
 0x55e   : > { %2409 = vrot.lane.b32.xlu2 %v2388_v2, %s3920_s21 }
 0x560   : > { %v2450_v3 = vpop.permute.xlu2 %2449  ;;  %v3730_v48 = vld [vmem:[#allocation3 + $0x48] sm:$0xff] }
 0x561   : > { %2472 = vst.msk [vmem:[#allocation3 + $0x2c] sm:$0xf] %vm2374_vm7, %v2450_v3 }
 0x564   : > { %2407 = vrot.lane.b32.xlu0 %v2387_v5, %s3920_s21  ;;  %s3366_s21 = sshll.u32 %s4073_s23, 5 }
 0x565   : > { %2455 = vrot.lane.b32.xlu1 %v2435_v4, %s3919_s14  ;;  %s423_s27 = scalar_lea.vmem [#allocation8], %s3366_s21 }
 0x566   : > { %v2673_v7 = vpop.permute.xlu0 %2672  ;;  %s3270_s28 = sshll.u32 %s423_s27, 4  ;;  %s3271_s28 = int_to_ptr.vmem [resolvable:$true] %s3270_s28 }
 0x567   : > { %v2562_v6 = vpop.permute.xlu1 %2561  ;;  %2696 = vst.msk [vmem:[#allocation3 + $0x20] sm:$0xf] %vm2374_vm7, %v2673_v7 }
 0x568   : > { %2584 = vst.msk [vmem:[#allocation3 + $0x38] sm:$0xf] %vm2374_vm7, %v2562_v6  ;;  %v2402_v9 = vpop.permute.xlu2 %2401  ;;  %v3727_v56 = vld [vmem:[#allocation3 + $0x2c] sm:$0xff]  ;;  %v4659_v6 = vld [vmem:[%s4761_s7] sm:$0x1] }
 0x569   : > { %2424 = vst.msk [vmem:[#allocation3 + $0x28] sm:$0xf] %vm2374_vm7, %v2402_v9 }
 0x56e   : > { %v2625_v10 = vpop.permute.xlu0 %2624  ;;  %v2713_v61 = vld [vmem:[#allocation3 + $0x20] sm:$0xf] }
 0x56f   : > { %v2560_v11 = vpop.permute.xlu1 %2559  ;;  %2648 = vst.msk [vmem:[#allocation3 + $0x1c] sm:$0xf] %vm2374_vm7, %v2625_v10  ;;  %v2801_v16 = vunpack.c.l.b16 %v2713_v61 }
 0x570   : > { %v2677_v15 = vpop.permute.xlu2 %2676  ;;  %2583 = vst.msk [vmem:[#allocation3 + $0x14] sm:$0xf] %vm2374_vm7, %v2560_v11  ;;  %v3726_v59 = vld [vmem:[#allocation3 + $0x24] sm:$0xff] }
 0x571   : > { %2698 = vst.msk [vmem:[#allocation3 + $0x68] sm:$0xf] %vm2374_vm7, %v2677_v15  ;;  %v2806_v27 = vpack.c.b16 %v2801_v16, %v2801_v16 }
 0x573   : > { %v2816_v58 = vsel %vm1583_vm2, %v2806_v27, 0 }
 0x574   : > { %2821 = vmatpush.bf16.msrb.mxu0 %v2816_v58  ;;  %v2776_v58 = vld [vmem:[#allocation3 + $0x11c] sm:$0xf] }
 0x576   : > { %v2514_v23 = vpop.permute.xlu0 %2513  ;;  %v3725_v18 = vld [vmem:[#allocation3 + $0x18] sm:$0xff] }
 0x577   : > { %v2518_v49 = vpop.permute.xlu1 %2517  ;;  %2536 = vst.msk [vmem:[#allocation3 + $0x34] sm:$0xf] %vm2374_vm7, %v2514_v23 }
 0x578   : > { %v2629_v21 = vpop.permute.xlu2 %2628  ;;  %2538 = vst.msk [vmem:[#allocation3 + $0x7c] sm:$0xf] %vm2374_vm7, %v2518_v49  ;;  %v2731_v12 = vld [vmem:[#allocation3 + $0x68] sm:$0xf]  ;;  %2822 = vmatpush.bf16.msrb.mxu0 %v3725_v18  ;;  %v3106_v18 = vunpack.c.l.b16 %v2776_v58 }
 0x579   : > { %2650 = vst.msk [vmem:[#allocation3 + $0x64] sm:$0xf] %vm2374_vm7, %v2629_v21  ;;  %v2891_v13 = vunpack.c.l.b16 %v2731_v12 }
 0x57b   : > { %v2896_v17 = vpack.c.b16 %v2891_v13, %v2891_v13 }
 0x57d   : > { %v2902_v24 = vsel %vm1583_vm2, %v2896_v17, 0 }
 0x57e   : > { %2907 = vmatpush.bf16.msrb.mxu2 %v2902_v24  ;;  %v2512_v28 = vpop.permute.xlu0 %2511  ;;  %v3728_v52 = vld [vmem:[#allocation3 + $0x34] sm:$0xff]  ;;  %v3111_v24 = vpack.c.b16 %v3106_v18, %v3106_v18 }
 0x57f   : > { %v2675_v29 = vpop.permute.xlu1 %2674  ;;  %2535 = vst.msk [vmem:[#allocation3 + $0x10] sm:$0xf] %vm2374_vm7, %v2512_v28 }
 0x580   : > { %v2566_v22 = vpop.permute.xlu2 %2565  ;;  %2697 = vst.msk [vmem:[#allocation3 + $0x44] sm:$0xf] %vm2374_vm7, %v2675_v29  ;;  %v3733_v19 = vld [vmem:[#allocation3 + $0x60] sm:$0xff]  ;;  %v3117_v29 = vsel %vm1583_vm2, %v3111_v24, 0 }
 0x581   : > { %2586 = vst.msk [vmem:[#allocation3 + $0x80] sm:$0xf] %vm2374_vm7, %v2566_v22 }
 0x582   : > { %2908 = vmatpush.bf16.msrb.mxu2 %v3733_v19 }
 0x586   : > { %v2516_v30 = vpop.permute.xlu0 %2515  ;;  %v3724_v31 = vld [vmem:[#allocation3 + $0x10] sm:$0xff] }
 0x587   : > { %v2564_v14 = vpop.permute.xlu1 %2563  ;;  %v2722_v25 = vld [vmem:[#allocation3 + $0x44] sm:$0xf]  ;;  %2537 = vst.msk [vmem:[#allocation3 + $0x58] sm:$0xf] %vm2374_vm7, %v2516_v30  ;;  %2823 = vmatpush.bf16.msrb.mxu0 %v3724_v31  ;;  %v3753_v30 = vld [vmem:[#allocation3 + $0x114] sm:$0xff] }
 0x588   : > { %2585 = vst.msk [vmem:[#allocation3 + $0x5c] sm:$0xf] %vm2374_vm7, %v2564_v14  ;;  %v2454_v32 = vpop.permute.xlu2 %2453  ;;  %v2848_v33 = vunpack.c.l.b16 %v2722_v25  ;;  %v3736_v23 = vld [vmem:[#allocation3 + $0x7c] sm:$0xff] }
 0x589   : > { %2474 = vst.msk [vmem:[#allocation3 + $0x74] sm:$0xf] %vm2374_vm7, %v2454_v32  ;;  %v2777_v32 = vld [vmem:[#allocation4] sm:$0x1] }
 0x58a   : > { %v2853_v34 = vpack.c.b16 %v2848_v33, %v2848_v33  ;;  %2780 = vperm.xlu1 %3814, %v2777_v32  }
 0x58b   : > { %2824 = vmatpush.bf16.msrb.mxu0 %v3723_v35 }
 0x58c   : > { %v2859_v36 = vsel %vm1583_vm2, %v2853_v34, 0 }
 0x58d   : > { %2864 = vmatpush.bf16.msra.mxu1 %v2859_v36 }
 0x58e   : > { %v2627_v38 = vpop.permute.xlu0 %2626 }
 0x58f   : > { %v2681_v37 = vpop.permute.xlu1 %2680  ;;  %v3732_v20 = vld [vmem:[#allocation3 + $0x58] sm:$0xff]  ;;  %2649 = vst.msk [vmem:[#allocation3 + $0x40] sm:$0xf] %vm2374_vm7, %v2627_v38  ;;  %2825 = vmatpush.bf16.msrb.mxu0 %v3722_v39 }
 0x590   : > { %2700 = vst.msk [vmem:[#allocation3 + $0xb0] sm:$0xf] %vm2374_vm7, %v2681_v37  ;;  %v2406_v40 = vpop.permute.xlu2 %2405  ;;  %2909 = vmatpush.bf16.msrb.mxu2 %v3732_v20  ;;  %v3735_v13 = vld [vmem:[#allocation3 + $0x74] sm:$0xff] }
 0x591   : > { %2426 = vst.msk [vmem:[#allocation3 + $0x70] sm:$0xf] %vm2374_vm7, %v2406_v40 }
 0x592   : > { %3558 = vmatmul.msk.bf16.vlgmr.msrb.gmra.mxu0 %vm2811_vm10, %v4659_v6 }
 0x594   : > { %2910 = vmatpush.bf16.msrb.mxu2 %v3731_v41 }
 0x596   : > { %v2412_v44 = vpop.permute.xlu0 %2411  ;;  %v3729_v47 = vld [vmem:[#allocation3 + $0x3c] sm:$0xff] }
 0x597   : > { %v2460_v42 = vpop.permute.xlu1 %2459  ;;  %v2749_v45 = vld [vmem:[#allocation3 + $0xb0] sm:$0xf]  ;;  %2429 = vst.msk [vmem:[#allocation3 + $0xdc] sm:$0xf] %vm2374_vm7, %v2412_v44  ;;  %2865 = vmatpush.bf16.msra.mxu1 %v3729_v47 }
 0x598   : > { %2477 = vst.msk [vmem:[#allocation3 + $0xe0] sm:$0xf] %vm2374_vm7, %v2460_v42  ;;  %v2633_v46 = vpop.permute.xlu2 %2632  ;;  %v2977_v50 = vunpack.c.l.b16 %v2749_v45  ;;  %2911 = vmatpush.bf16.msrb.mxu2 %v3730_v48  ;;  %v3734_v28 = vld [vmem:[#allocation3 + $0x6c] sm:$0xff] }
 0x599   : > { %2652 = vst.msk [vmem:[#allocation3 + $0xac] sm:$0xf] %vm2374_vm7, %v2633_v46 }
 0x59a   : > { %v2982_v26 = vpack.c.b16 %v2977_v50, %v2977_v50 }
 0x59b   : > { %2866 = vmatpush.bf16.msra.mxu1 %v3728_v52  ;;  %3592 = vmatmul.msk.bf16.vlgmr.msrb.gmra.mxu2 %vm2811_vm10, %v4659_v6 }
 0x59c   : > { %v2988_v51 = vsel %vm1583_vm2, %v2982_v26, 0 }
 0x59d   : > { %2993 = vmatpush.bf16.msra.mxu0 %v2988_v51 }
 0x59e   : > { %v2631_v55 = vpop.permute.xlu0 %2630  ;;  %v3746_v46 = vld [vmem:[#allocation3 + $0xd8] sm:$0xff] }
 0x59f   : > { %v2522_v54 = vpop.permute.xlu1 %2521  ;;  %2651 = vst.msk [vmem:[#allocation3 + $0x88] sm:$0xf] %vm2374_vm7, %v2631_v55  ;;  %2867 = vmatpush.bf16.msra.mxu1 %v3727_v56  ;;  %v3747_v20 = vld [vmem:[#allocation3 + $0xe0] sm:$0xff] }
 0x5a0   : > { %2540 = vst.msk [vmem:[#allocation3 + $0xc4] sm:$0xf] %vm2374_vm7, %v2522_v54  ;;  %v2570_v43 = vpop.permute.xlu2 %2569  ;;  %v3741_v57 = vld [vmem:[#allocation3 + $0xa8] sm:$0xff] }
 0x5a1   : > { %2588 = vst.msk [vmem:[#allocation3 + $0xc8] sm:$0xf] %vm2374_vm7, %v2570_v43  ;;  %2994 = vmatpush.bf16.msra.mxu0 %v3741_v57 }
 0x5a3   : > { %2868 = vmatpush.bf16.msra.mxu1 %v3726_v59 }
 0x5a6   : > { %v2637_v62 = vpop.permute.xlu0 %2636  ;;  %3575 = vmatmul.msk.bf16.vlgmr.msra.gmra.mxu1 %vm2811_vm10, %v4659_v6  ;;  %v3737_v11 = vld [vmem:[#allocation3 + $0x84] sm:$0xff] }
 0x5a7   : > { %v2679_v60 = vpop.permute.xlu1 %2678  ;;  %2654 = vst.msk [vmem:[#allocation3 + $0xf4] sm:$0xf] %vm2374_vm7, %v2637_v62 }
 0x5a8   : > { %2699 = vst.msk [vmem:[#allocation3 + $0x8c] sm:$0xf] %vm2374_vm7, %v2679_v60  ;;  %v2462_v63 = vpop.permute.xlu2 %2461  ;;  %v3744_v40 = vld [vmem:[#allocation3 + $0xc4] sm:$0xff] }
 0x5a9   : > { %2478 = vst.msk [vmem:[#allocation3 + $0x104] sm:$0xf] %vm2374_vm7, %v2462_v63 }
 0x5ae   : > { %v2526_v1 = vpop.permute.xlu0 %2525  ;;  %v3749_v17 = vld [vmem:[#allocation3 + $0xf0] sm:$0xff] }
 0x5af   : > { %v2685_v0 = vpop.permute.xlu1 %2684  ;;  %v2740_v2 = vld [vmem:[#allocation3 + $0x8c] sm:$0xf]  ;;  %2542 = vst.msk [vmem:[#allocation3 + $0x10c] sm:$0xf] %vm2374_vm7, %v2526_v1 }
 0x5b0   : > { %2702 = vst.msk [vmem:[#allocation3 + $0xf8] sm:$0xf] %vm2374_vm7, %v2685_v0  ;;  %v2568_v3 = vpop.permute.xlu2 %2567  ;;  %v2934_v4 = vunpack.c.l.b16 %v2740_v2  ;;  %v3751_v39 = vld [vmem:[#allocation3 + $0x104] sm:$0xff] }
 0x5b1   : > { %2587 = vst.msk [vmem:[#allocation3 + $0xa4] sm:$0xf] %vm2374_vm7, %v2568_v3 }
 0x5b2   : > { %v2939_v5 = vpack.c.b16 %v2934_v4, %v2934_v4 }
 0x5b4   : > { %v2945_v7 = vsel %vm1583_vm2, %v2939_v5, 0 }
 0x5b5   : > { %2950 = vmatpush.bf16.msrb.mxu3 %v2945_v7 }
 0x5b6   : > { %v2524_v10 = vpop.permute.xlu0 %2523 }
 0x5b7   : > { %v2574_v9 = vpop.permute.xlu1 %2573  ;;  %v2767_v15 = vld [vmem:[#allocation3 + $0xf8] sm:$0xf]  ;;  %2541 = vst.msk [vmem:[#allocation3 + $0xe8] sm:$0xf] %vm2374_vm7, %v2524_v10 }
 0x5b8   : > { %2590 = vst.msk [vmem:[#allocation3 + $0x110] sm:$0xf] %vm2374_vm7, %v2574_v9  ;;  %v2410_v61 = vpop.permute.xlu2 %2409  ;;  %v3063_v16 = vunpack.c.l.b16 %v2767_v15 }
 0x5b9   : > { %2951 = vmatpush.bf16.msrb.mxu3 %v3737_v11  ;;  %2428 = vst.msk [vmem:[#allocation3 + $0xb8] sm:$0xf] %vm2374_vm7, %v2410_v61 }
 0x5ba   : > { %v3068_v27 = vpack.c.b16 %v3063_v16, %v3063_v16 }
 0x5bc   : > { %v3074_v49 = vsel %vm1583_vm2, %v3068_v27, 0 }
 0x5bd   : > { %2952 = vmatpush.bf16.msrb.mxu3 %v3736_v23  ;;  %3079 = vmatpush.bf16.msra.mxu2 %v3074_v49 }
 0x5be   : > { %v2635_v12 = vpop.permute.xlu0 %2634 }
 0x5bf   : > { %v2683_v21 = vpop.permute.xlu1 %2682  ;;  %2653 = vst.msk [vmem:[#allocation3 + $0xd0] sm:$0xf] %vm2374_vm7, %v2635_v12  ;;  %v3752_v34 = vld [vmem:[#allocation3 + $0x10c] sm:$0xff] }
 0x5c0   : > { %2701 = vst.msk [vmem:[#allocation3 + $0xd4] sm:$0xf] %vm2374_vm7, %v2683_v21  ;;  %v3742_v48 = vld [vmem:[#allocation3 + $0xb4] sm:$0xff] }
 0x5c1   : > { %2953 = vmatpush.bf16.msrb.mxu3 %v3735_v13  ;;  %3080 = vmatpush.bf16.msra.mxu2 %v3749_v17 }
 0x5c5   : > { %2954 = vmatpush.bf16.msrb.mxu3 %v3734_v28 }
 0x5c6   : > { %v2414_v19 = vpop.permute.xlu0 %2413  ;;  %v3745_v37 = vld [vmem:[#allocation3 + $0xcc] sm:$0xff] }
 0x5c7   : > { %v2572_v22 = vpop.permute.xlu1 %2571  ;;  %v2758_v14 = vld [vmem:[#allocation3 + $0xd4] sm:$0xf]  ;;  %2430 = vst.msk [vmem:[#allocation3 + $0x100] sm:$0xf] %vm2374_vm7, %v2414_v19 }
 0x5c8   : > { %2589 = vst.msk [vmem:[#allocation3 + $0xec] sm:$0xf] %vm2374_vm7, %v2572_v22  ;;  %v3020_v31 = vunpack.c.l.b16 %v2758_v14  ;;  %3609 = vmatmul.msk.bf16.vlgmr.msrb.gmra.mxu3 %vm2811_vm10, %v4659_v6 }
 0x5c9   : > { %3122 = vmatpush.bf16.msra.mxu3 %v3117_v29 }
 0x5ca   : > { %v3025_v25 = vpack.c.b16 %v3020_v31, %v3020_v31 }
 0x5cc   : > { %v3031_v33 = vsel %vm1583_vm2, %v3025_v25, 0 }
 0x5cd   : > { %3123 = vmatpush.bf16.msra.mxu3 %v3753_v30  ;;  %3036 = vmatpush.bf16.msrb.mxu1 %v3031_v33 }
 0x5ce   : > { %v2458_v36 = vpop.permute.xlu0 %2457  ;;  %v3750_v41 = vld [vmem:[#allocation3 + $0xfc] sm:$0xff] }
 0x5cf   : > { %v2520_v35 = vpop.permute.xlu1 %2519  ;;  %v3748_v38 = vld [vmem:[#allocation3 + $0xe8] sm:$0xff]  ;;  %2476 = vst.msk [vmem:[#allocation3 + $0xbc] sm:$0xf] %vm2374_vm7, %v2458_v36 }
 0x5d0   : > { %2539 = vst.msk [vmem:[#allocation3 + $0xa0] sm:$0xf] %vm2374_vm7, %v2520_v35  ;;  %3081 = vmatpush.bf16.msra.mxu2 %v3748_v38 }
 0x5d1   : > { %3124 = vmatpush.bf16.msra.mxu3 %v3752_v34  ;;  %3037 = vmatpush.bf16.msrb.mxu1 %v3745_v37 }
 0x5d4   : > { %3082 = vmatpush.bf16.msra.mxu2 %v3747_v20 }
 0x5d5   : > { %3125 = vmatpush.bf16.msra.mxu3 %v3751_v39  ;;  %3038 = vmatpush.bf16.msrb.mxu1 %v3744_v40 }
 0x5d6   : > { %v2408_v44 = vpop.permute.xlu0 %2407  ;;  %v3743_v47 = vld [vmem:[#allocation3 + $0xbc] sm:$0xff] }
 0x5d7   : > { %v2456_v42 = vpop.permute.xlu1 %2455  ;;  %v3740_v45 = vld [vmem:[#allocation3 + $0xa0] sm:$0xff]  ;;  %2427 = vst.msk [vmem:[#allocation3 + $0x94] sm:$0xf] %vm2374_vm7, %v2408_v44 }
 0x5d8   : > { %2475 = vst.msk [vmem:[#allocation3 + $0x98] sm:$0xf] %vm2374_vm7, %v2456_v42  ;;  %2995 = vmatpush.bf16.msra.mxu0 %v3740_v45  ;;  %3083 = vmatpush.bf16.msra.mxu2 %v3746_v46  ;;  %v3754_v45 = vld [vmem:[%s4763_s9] sm:$0xff] }
 0x5d9   : > { %3126 = vmatpush.bf16.msra.mxu3 %v3750_v41  ;;  %3039 = vmatpush.bf16.msrb.mxu1 %v3743_v47 }
 0x5db   : > { %3660 = vmatmul.msk.bf16.vlgmr.msra.gmra.mxu2 %vm2811_vm10, %v4659_v6 }
 0x5dc   : > { %3677 = vmatmul.msk.bf16.vlgmr.msra.gmra.mxu3 %vm2811_vm10, %v4659_v6 }
 0x5dd   : > { %3040 = vmatpush.bf16.msrb.mxu1 %v3742_v48 }
 0x5de   : > { %v3738_v26 = vld [vmem:[#allocation3 + $0x90] sm:$0xff] }
 0x5df   : > { %v3739_v50 = vld [vmem:[#allocation3 + $0x98] sm:$0xff] }
 0x5e0   : > { %2996 = vmatpush.bf16.msra.mxu0 %v3739_v50  ;;  %3643 = vmatmul.msk.bf16.vlgmr.msrb.gmra.mxu1 %vm2811_vm10, %v4659_v6 }
 0x5e4   : > { %2997 = vmatpush.bf16.msra.mxu0 %v3738_v26 }
 0x5e7   : > { %3626 = vmatmul.msk.bf16.vlgmr.msra.gmra.mxu0 %vm2811_vm10, %v4659_v6 }
 0x5fc   : > { %v2781_v59 = vpop.permute.xlu1 %2780 }
 0x5fd   : > { %v2783_v60 = vperm.slane %v2781_v59, 0 }
 0x60f   : > { %v2827_v52 = vpop.f32.mrf.mxu0 }
 0x610   : > { %v2828_v4 = vadd.f32 %v2827_v52, %v2783_v60 }
 0x612   : > { %v3132_v23 = vmax.f32 %v2828_v4, 0.0 }
 0x617   : > { %v2829_v43 = vpop.f32.mrf.mxu0 }
 0x61e   : > { %v2913_v54 = vpop.f32.mrf.mxu2 }
 0x61f   : > { %v2914_v1 = vadd.f32 %v2913_v54, %v2783_v60 }
 0x621   : > { %v3134_v6 = vmax.f32 %v2914_v1, 0.0 }
 0x623   : > { %v2870_v51 = vpop.f32.mrf.mxu1  ;;  %v3140_v49 = vrot.slane %v3134_v6, 4 }
 0x624   : > { %v2871_v0 = vadd.f32 %v2870_v51, %v2783_v60 }
 0x625   : > { %v3141_v22 = vsel %vm1055_vm1, %v3140_v49, %v3132_v23 }
 0x626   : > { %v2915_v56 = vpop.f32.mrf.mxu2  ;;  %v3133_v9 = vmax.f32 %v2871_v0, 0.0  ;;  %v3145_v32 = vperm.slane %v3141_v22, %v4151_v8 }
 0x62b   : > { %v2872_v55 = vpop.f32.mrf.mxu1 }
 0x64b   : > { %v2956_v57 = vpop.f32.mrf.mxu3 }
 0x64c   : > { %v2957_v63 = vadd.f32 %v2956_v57, %v2783_v60 }
 0x64e   : > { %v3135_v2 = vmax.f32 %v2957_v63, 0.0 }
 0x650   : > { %v3146_v10 = vrot.slane %v3135_v2, 4 }
 0x652   : > { %v3147_v18 = vsel %vm1055_vm1, %v3146_v10, %v3133_v9 }
 0x653   : > { %v2958_v62 = vpop.f32.mrf.mxu3  ;;  %v3151_v24 = vperm.slane %v3147_v18, %v4151_v8 }
 0x655   : > { %v3164_v25 = vrot.slane %v3151_v24, 4 }
 0x657   : > { %v3165_v37 = vsel %vm1055_vm1, %v3164_v25, %v3145_v32 }
 0x658   : > { %v3169_v40 = vperm.slane %v3165_v37, %v4173_v53 }
 0x65d   : > { %v3042_v7 = vpop.f32.mrf.mxu1 }
 0x65e   : > { %v3043_v11 = vadd.f32 %v3042_v7, %v2783_v60  ;;  %v3085_v15 = vpop.f32.mrf.mxu2 }
 0x65f   : > { %v3128_v3 = vpop.f32.mrf.mxu3  ;;  %v3086_v16 = vadd.f32 %v3085_v15, %v2783_v60 }
 0x660   : > { %v3129_v5 = vadd.f32 %v3128_v3, %v2783_v60  ;;  %v3137_v27 = vmax.f32 %v3043_v11, 0.0 }
 0x661   : > { %v3138_v12 = vmax.f32 %v3086_v16, 0.0 }
 0x662   : > { %v3139_v61 = vmax.f32 %v3129_v5, 0.0 }
 0x663   : > { %v3152_v30 = vrot.slane %v3138_v12, 4 }
 0x664   : > { %v3158_v58 = vrot.slane %v3139_v61, 4  ;;  %v2999_v13 = vpop.f32.mrf.mxu0 }
 0x665   : > { %v3000_v28 = vadd.f32 %v2999_v13, %v2783_v60  ;;  %v3044_v29 = vpop.f32.mrf.mxu1 }
 0x666   : > { %v3159_v21 = vsel %vm1055_vm1, %v3158_v58, %v3137_v27  ;;  %v3087_v14 = vpop.f32.mrf.mxu2 }
 0x667   : > { %v3130_v17 = vpop.f32.mrf.mxu3  ;;  %v3163_v19 = vperm.slane %v3159_v21, %v4151_v8  ;;  %v3136_v31 = vmax.f32 %v3000_v28, 0.0 }
 0x669   : > { %v3153_v33 = vsel %vm1055_vm1, %v3152_v30, %v3136_v31  ;;  %v3170_v34 = vrot.slane %v3163_v19, 4 }
 0x66a   : > { %v3157_v35 = vperm.slane %v3153_v33, %v4151_v8  ;;  %v3755_v8 = vld [vmem:[%s4763_s9 + $0x8] sm:$0xff] }
 0x66c   : > { %v3171_v36 = vsel %vm1055_vm1, %v3170_v34, %v3157_v35  ;;  %v3001_v38 = vpop.f32.mrf.mxu0 }
 0x66d   : > { %v3175_v39 = vperm.slane %v3171_v36, %v4173_v53  ;;  %v3223_v53 = vld [vmem:[%s4764_s10] sm:$0xf] }
 0x66e   : > { %v3231_v46 = vsel %vm1583_vm2, %v3223_v53, 0 }
 0x66f   : > { %v3176_v20 = vrot.slane %v3175_v39, 4  ;;  %3240 = vmatpush.bf16.msra.mxu1 %v3231_v46 }
 0x671   : > { %v3177_v41 = vsel %vm1055_vm1, %v3176_v20, %v3169_v40 }
 0x672   : > { %v3178_v42 = vpack.c.bf16 %v3177_v41, %v3177_v41 }
 0x674   : > { %v3200_v44 = vsel %vm1583_vm2, %v3178_v42, 0 }
 0x675   : > { %3209 = vmatpush.bf16.msrb.mxu0 %v3200_v44 }
 0x678   : > { %3686 = vmatmul.msk.bf16.vlgmr.msrb.gmra.mxu0 %vm1558_vm3, %v3754_v45 }
 0x688   : > { %3687 = vmatmul.msk.bf16.gmra.mxu0 %vm1558_vm3, %v3755_v8 }
 0x6f5   : > { %v3211_v47 = vpop.f32.mrf.mxu0 }
 0x6fd   : > { %v3213_v48 = vpop.f32.mrf.mxu0 }
 0x6fe   : > { %v3221_v50 = vpack.c.bf16 %v3213_v48, %v3211_v47 }
 0x700   : > { %3688 = vmatmul.msk.bf16.vlgmr.msra.gmra.mxu1 %vm1558_vm3, %v3221_v50 }
 0x705   : > { %v3216_v26 = vpop.f32.mrf.mxu0 }
 0x70d   : > { %v3218_v51 = vpop.f32.mrf.mxu0 }
 0x70e   : > { %v3222_v52 = vpack.c.bf16 %v3218_v51, %v3216_v26 }
 0x710   : > { %3689 = vmatmul.msk.bf16.gmra.mxu1 %vm1558_vm3, %v3222_v52 }
 0x77d   : > { %v3242_v54 = vpop.f32.mrf.mxu1 }
 0x77e   : > { %3253 = vst.msk [vmem:[%s423_s27] sm:$0xff] %vm3252_vm11, %v3242_v54 }
 0x785   : > { %v3244_v55 = vpop.f32.mrf.mxu1 }
 0x786   : > { %3254 = vst.msk [vmem:[%s423_s27 + $0x8] sm:$0xff] %vm3252_vm11, %v3244_v55 }
 0x78d   : > { %v3247_v43 = vpop.f32.mrf.mxu1 }
 0x78e   : > { %3255 = vst.msk [vmem:[%s423_s27 + $0x10] sm:$0xff] %vm3252_vm11, %v3247_v43 }
 0x795   : > { %v3249_v56 = vpop.f32.mrf.mxu1 }
 0x796   : > { %3256 = vst.msk [vmem:[%s423_s27 + $0x18] sm:$0xff] %vm3252_vm11, %v3249_v56 }
 0x797   : > { %3873 = shalt.err (!%p3870_p7)
}
 0x798   : > { %s3922_s23 = smov 128   ;;  %s3923_s27 = smov 8  }
 0x799   : > { %3760 = dma.vmem_to_hbm [thread:$0]  (%p4037_p11), %s3271_s28, 512, %s3273_s16, %s3258_s17, %s3922_s23, %s3922_s23, %s3923_s27  }
 0x79a PF: > { %s3287_s25 = sand.u32 1, %s3900_s19   ;;  %p4780_p5 = scmp.ge.s32.totalorder %s3912_s22, 2 }
 0x79b   : > { %s3288_s26 = scalar_lea.sflag [#allocation7], %s3287_s25 }
 0x79c   : > { %p3767_p8 = pnand %p4780_p5, %p4041_p12 }
 0x79e   : > { %p3768_p10 = pneg %p3767_p8 }
 0x7a0   : > { %3895 = dma.done.wait (%p3768_p10), %s3288_s26, 512  }
 0x7a1   : > { %3897 = vsyncadd (%p3768_p10), %s3288_s26, 4294966784  ;;  %s4781_s22 = sld [smem:[#allocation12_spill]]  ;;  %s4784_s19 = smov %s3904_s20 }
 0x7a2   : > { %s4782_s15 = sld [smem:[#allocation11_spill]] }
 0x7a3   : > { %s4783_s21 = sld [smem:[#allocation13_spill]] }
 0x7a7   : > { %p26_p2 = scmp.ge.s32.totalorder %s4781_s22, 4  }
 0x7a8   : > { %s4785_s20 = smov %s4782_s15 }
 0x7a9   :  { %28 = sbr.rel (!%p26_p2) target bundleno = 8 (0x8), region = 116 }
 0x7ae   :  { %3294 = vsyncpa [#allocation6], 1 }
 0x7af   :  { %3296 = vsyncpa [#allocation6 + $0x1], 1 }
 0x7b0   :  { %3297 = vsyncpa [#allocation7], 1 }
 0x7b1   :  { %3299 = vsyncpa [#allocation7 + $0x1], 1 }

</bundles_post_ra>
